<compile_context>
chip_gen: v7x
topology: tpu7x:2x2x1
jax: 0.10.0
libtpu: 0.0.40
codegen_flags: <defaults>
</compile_context>

<pallas_src>
import jax
import jax.numpy as jnp
from jax.experimental import pallas as pl
from jax.experimental.pallas import tpu as pltpu


def _round_up(x, m):
    return ((x + m - 1) // m) * m


# -----------------------------------------------------------------------------
# Pallas kernel: one point tile; full view loop + MLP + head, lane-dense.
# -----------------------------------------------------------------------------
def _sdf_kernel(pts_ref, proj_ref, imgf_ref, w1p_ref, w1uv_ref, b1_ref,
                w2_ref, whead_ref, bhead_ref, sdf_ref):
    """
    pts_ref   : (B, 3, TP)   point tile, xyz on sublanes, points on lanes
    proj_ref  : (V*B*16,)    SMEM, flattened view-major (V, B, 4, 4) projections
    imgf_ref  : (V, B, F, 1) per-view image code with b2 already folded in
    w1p_ref   : (H, 3)   w1uv_ref : (H, 2)   b1_ref : (H, 1)
    w2_ref    : (F, H)   whead_ref: (F, 1)   (pre-scaled by 1/num_views)
    bhead_ref : (1,)     SMEM scalar
    sdf_ref   : (B, TP)
    """
    X_all = pts_ref[...].astype(jnp.float32)        # (B, 3, TP)
    B = X_all.shape[0]
    TP = X_all.shape[-1]
    V = imgf_ref.shape[0]
    F = w2_ref.shape[0]

    w1p_t = w1p_ref[...]                            # (H, 3)
    w1uv_t = w1uv_ref[...]                          # (H, 2)
    b1_t = b1_ref[...]                              # (H, 1)
    w2_t = w2_ref[...]                              # (F, H)
    wh_c = whead_ref[...]                           # (F, 1), already / num_views
    b_head = bhead_ref[0]                           # scalar (SMEM)

    rows = []
    # B and V are small & static -> full unroll (== lax.fori_loop(unroll=True)).
    for b in range(B):
        X = X_all[b]                                # (3, TP) lane-dense
        x0, x1, x2 = X[0:1], X[1:2], X[2:3]         # (1, TP) each

        # view-invariant first-layer term: computed once per point tile (hoisted)
        h1_base = jnp.dot(w1p_t, X, preferred_element_type=jnp.float32) + b1_t  # (H, TP)

        acc = jnp.zeros((F, TP), jnp.float32)       # sum of relu'd features over views
        for v in range(V):
            off = (v * B + b) * 16                  # static scalar offsets into SMEM

            def _prow(j, _off=off):                 # scalar-broadcast FMAs over lanes
                return (proj_ref[_off + 4 * j + 0] * x0 +
                        proj_ref[_off + 4 * j + 1] * x1 +
                        proj_ref[_off + 4 * j + 2] * x2 +
                        proj_ref[_off + 4 * j + 3])

            qx, qy, qw = _prow(0), _prow(1), _prow(3)            # (1, TP)
            inv_w = pl.reciprocal(qw + 1e-8, approx=True)        # EUP slot
            uv = jnp.concatenate([qx * inv_w, qy * inv_w], axis=0)  # (2, TP)

            h1 = jnp.maximum(
                h1_base + jnp.dot(w1uv_t, uv, preferred_element_type=jnp.float32),
                0.0)                                             # (H, TP)
            feat = jnp.maximum(
                jnp.dot(w2_t, h1, preferred_element_type=jnp.float32) + imgf_ref[v, b],
                0.0)                                             # (F, TP)
            acc = acc + feat

        # head on the summed features (1/V already folded into wh_c)
        sdf_b = jnp.sum(acc * wh_c, axis=0, keepdims=True) + b_head  # (1, TP)
        rows.append(sdf_b)

    sdf_ref[...] = jnp.concatenate(rows, axis=0).astype(sdf_ref.dtype)  # (B, TP)


# -----------------------------------------------------------------------------
# Wrapper: tiling, padding, weight packing, pallas_call.
# -----------------------------------------------------------------------------
def _pack_params(params, num_views):
    return {
        "w1p_t": jnp.asarray(params["w1p"]).T,                         # (H, 3)
        "w1uv_t": jnp.asarray(params["w1uv"]).T,                       # (H, 2)
        "b1_t": jnp.asarray(params["b1"]).reshape(-1, 1),              # (H, 1)
        "w2_t": jnp.asarray(params["w2"]).T,                           # (F, H)
        "w_head_c": jnp.asarray(params["w_head"]).reshape(-1, 1) / num_views,  # (F, 1)
        "b_head": jnp.asarray(params["b_head"]).reshape(1),            # (1,)
    }


def _backbone_head_pallas(points, proj_flat, imgf, wp, tile_p=512):
    """points: (B, M, 3); proj_flat: (V*B*16,); imgf: (V, B, F, 1) -> sdf (B, M)."""
    B, M, _ = points.shape
    V, _, F, _ = imgf.shape
    H = wp["w1p_t"].shape[0]

    tile = min(tile_p, _round_up(M, 128))           # lane-aligned tile
    M_pad = _round_up(M, tile)                      # cdiv padding instead of assert
    pts_t = jnp.transpose(points, (0, 2, 1))        # (B, 3, M): points on lanes
    if M_pad != M:
        pts_t = jnp.pad(pts_t, ((0, 0), (0, 0), (0, M_pad - M)))

    sdf = pl.pallas_call(
        _sdf_kernel,
        out_shape=jax.ShapeDtypeStruct((B, M_pad), jnp.float32),
        grid_spec=pltpu.PrefetchScalarGridSpec(
            num_scalar_prefetch=0,
            grid=(M_pad // tile,),
            in_specs=[
                pl.BlockSpec((B, 3, tile), lambda i: (0, 0, i)),        # points tile
                pl.BlockSpec(memory_space=pltpu.MemorySpace.SMEM),      # proj scalars
                pl.BlockSpec((V, B, F, 1), lambda i: (0, 0, 0, 0)),     # img code (+b2)
                pl.BlockSpec((H, 3), lambda i: (0, 0)),                 # W1p^T
                pl.BlockSpec((H, 2), lambda i: (0, 0)),                 # W1uv^T
                pl.BlockSpec((H, 1), lambda i: (0, 0)),                 # b1
                pl.BlockSpec((F, H), lambda i: (0, 0)),                 # W2^T
                pl.BlockSpec((F, 1), lambda i: (0, 0)),                 # w_head / V
                pl.BlockSpec(memory_space=pltpu.MemorySpace.SMEM),      # b_head
            ],
            out_specs=pl.BlockSpec((B, tile), lambda i: (0, i)),        # lane-dense out
        ),
        compiler_params=pltpu.CompilerParams(
            dimension_semantics=("parallel",)),
    )(pts_t, proj_flat, imgf, wp["w1p_t"], wp["w1uv_t"], wp["b1_t"],
      wp["w2_t"], wp["w_head_c"], wp["b_head"])
    return sdf[:, :M]


# -----------------------------------------------------------------------------
# SDF_Feature.forward equivalent
# -----------------------------------------------------------------------------
def sdf_feature_forward(points, images, projection_matrices, params,
                        grad_method=None, h=1e-3, tile_p=512):
    B, N = points.shape[:2]
    V = images.shape[1]

    # glue: tiny image encoder (global average pool + linear); fold b2 into the code
    img_feat = jnp.mean(images, axis=(-2, -1)) @ params["w_img"]         # (B, V, F)
    img_code = img_feat + params["b2"]                                   # fold b2
    imgf = jnp.transpose(img_code, (1, 0, 2))[..., None]                 # (V, B, F, 1)
    proj_flat = jnp.transpose(projection_matrices, (1, 0, 2, 3)).reshape(-1)  # (V*B*16,)
    wp = _pack_params(params, V)

    if grad_method == "FD":
        step = h * jnp.array([[0., 0., 0.],
                              [1., 0., 0.],
                              [0., 1., 0.],
                              [0., 0., 1.]], jnp.float32)                # (4, 3)
        points_eval = (points[:, :, None, :] + step[None, None]).reshape(B, N * 4, 3)
        sdf_all = _backbone_head_pallas(points_eval, proj_flat, imgf, wp, tile_p)
        sdf_all = sdf_all.reshape(B, N, 4)
        sdf_at_points = sdf_all[:, :, 0]
        grads = jnp.stack([sdf_all[:, :, 1] - sdf_at_points,
                           sdf_all[:, :, 2] - sdf_at_points,
                           sdf_all[:, :, 3] - sdf_at_points], axis=-1) / h
        return sdf_at_points, grads
    elif grad_method == "AD":
        # TODO(synk): AD branch requires a custom_vjp through the Pallas kernel; not implemented.
        raise NotImplementedError("AD grad_method not supported in this synthetic port")
    else:
        return _backbone_head_pallas(points, proj_flat, imgf, wp, tile_p)


# -----------------------------------------------------------------------------
# Pure-JAX reference of the same synthetic backbone+head (for verification)
# -----------------------------------------------------------------------------
def reference_forward(points, images, projection_matrices, params):
    img_feat = jnp.mean(images, axis=(-2, -1)) @ params["w_img"]         # (B, V, F)
    proj = projection_matrices
    q = (jnp.einsum("bnk,bvjk->bvnj", points, proj[..., :3], precision="highest")
         + proj[:, :, None, :, 3])
    uv = q[..., :2] / (q[..., 3:4] + 1e-8)
    h1 = (jnp.einsum("bnk,kh->bnh", points, params["w1p"], precision="highest")[:, None]
          + jnp.einsum("bvnk,kh->bvnh", uv, params["w1uv"], precision="highest")
          + params["b1"][None, None])
    h1 = jnp.maximum(h1, 0.0)
    feat = (jnp.einsum("bvnh,hf->bvnf", h1, params["w2"], precision="highest")
            + params["b2"][None, None] + img_feat[:, :, None, :])
    feat = jnp.maximum(feat, 0.0)
    feat_mean = jnp.mean(feat, axis=1)                                   # (B, N, F)
    sdf = jnp.sum(feat_mean * params["w_head"][0][None, None, :], axis=-1) + params["b_head"][0, 0]
    return sdf


if __name__ == "__main__":
    B, N, V, C, Hi, Wi = 2, 256, 2, 4, 16, 16
    HID, F = 32, 32

    key = jax.random.PRNGKey(0)
    ks = jax.random.split(key, 12)
    points = 0.5 * jax.random.normal(ks[0], (B, N, 3), jnp.float32)
    images = jax.random.normal(ks[1], (B, V, C, Hi, Wi), jnp.float32)
    projection_matrices = (jnp.eye(4, dtype=jnp.float32)[None, None]
                           + 0.1 * jax.random.normal(ks[2], (B, V, 4, 4), jnp.float32))

    params = {
        "w_img":  0.2 * jax.random.normal(ks[3], (C, F), jnp.float32),
        "w1p":    0.3 * jax.random.normal(ks[4], (3, HID), jnp.float32),
        "w1uv":   0.3 * jax.random.normal(ks[5], (2, HID), jnp.float32),
        "b1":     0.1 * jax.random.normal(ks[6], (1, HID), jnp.float32),
        "w2":     0.2 * jax.random.normal(ks[7], (HID, F), jnp.float32),
        "b2":     0.1 * jax.random.normal(ks[8], (1, F), jnp.float32),
        "w_head": 0.2 * jax.random.normal(ks[9], (1, F), jnp.float32),
        "b_head": 0.1 * jax.random.normal(ks[10], (1, 1), jnp.float32),
    }

    # default branch (grad_method=None): sdf (B, N)
    sdf = sdf_feature_forward(points, images, projection_matrices, params)
    # finite-difference branch: sdf (B, N), grads (B, N, 3)
    sdf_fd, grads = sdf_feature_forward(points, images, projection_matrices, params,
                                        grad_method="FD", h=1e-3)
    jax.block_until_ready((sdf, sdf_fd, grads))

    assert sdf.shape == (B, N)
    assert sdf_fd.shape == (B, N) and grads.shape == (B, N, 3)

    ref = reference_forward(points, images, projection_matrices, params)
    # tolerance accounts for pl.reciprocal(approx=True) vs the exact divide in the reference
    assert bool(jnp.allclose(sdf, ref, atol=5e-3, rtol=5e-3)), "kernel mismatch vs reference"
    assert bool(jnp.allclose(sdf_fd, ref, atol=5e-3, rtol=5e-3)), "FD branch mismatch vs reference"

    print("KERNEL_OK")
</pallas_src>

<mosaic_0001>
module attributes {stable_mosaic.version = 11 : i64} {
  func.func @_sdf_kernel(%arg0: i32, %arg1: memref<2x3x256xf32, #tpu.memory_space<vmem>>, %arg2: memref<64xf32, #tpu.memory_space<smem>>, %arg3: memref<2x2x32x1xf32, #tpu.memory_space<vmem>>, %arg4: memref<32x3xf32, #tpu.memory_space<vmem>>, %arg5: memref<32x2xf32, #tpu.memory_space<vmem>>, %arg6: memref<32x1xf32, #tpu.memory_space<vmem>>, %arg7: memref<32x32xf32, #tpu.memory_space<vmem>>, %arg8: memref<32x1xf32, #tpu.memory_space<vmem>>, %arg9: memref<1xf32, #tpu.memory_space<smem>>, %arg10: memref<2x256xf32, #tpu.memory_space<vmem>>) attributes {dimension_semantics = [#tpu.dimension_semantics<parallel>], iteration_bounds = array<i64: 1>, scalar_prefetch = 0 : i64, scratch_operands = 0 : i64, tpu.core_type = #tpu.core_type<tc>, window_params = [{transform_indices = @transform_0, window_bounds = array<i64: 2, 3, 256>}, {transform_indices = @transform_1, window_bounds = array<i64: 64>}, {pipeline_mode = #tpu.pipeline_mode<synchronous>, transform_indices = @transform_2, window_bounds = array<i64: 2, 2, 32, 1>}, {pipeline_mode = #tpu.pipeline_mode<synchronous>, transform_indices = @transform_3, window_bounds = array<i64: 32, 3>}, {pipeline_mode = #tpu.pipeline_mode<synchronous>, transform_indices = @transform_4, window_bounds = array<i64: 32, 2>}, {pipeline_mode = #tpu.pipeline_mode<synchronous>, transform_indices = @transform_5, window_bounds = array<i64: 32, 1>}, {pipeline_mode = #tpu.pipeline_mode<synchronous>, transform_indices = @transform_6, window_bounds = array<i64: 32, 32>}, {pipeline_mode = #tpu.pipeline_mode<synchronous>, transform_indices = @transform_7, window_bounds = array<i64: 32, 1>}, {transform_indices = @transform_8, window_bounds = array<i64: 1>}, {transform_indices = @transform_9, window_bounds = array<i64: 2, 256>}]} {
    %c0 = arith.constant 0 : index
    %c0_0 = arith.constant 0 : index
    %c0_1 = arith.constant 0 : index
    %0 = vector.load %arg1[%c0, %c0_0, %c0_1] : memref<2x3x256xf32, #tpu.memory_space<vmem>>, vector<2x3x256xf32>
    %c0_2 = arith.constant 0 : index
    %c0_3 = arith.constant 0 : index
    %1 = vector.load %arg4[%c0_2, %c0_3] : memref<32x3xf32, #tpu.memory_space<vmem>>, vector<32x3xf32>
    %c0_4 = arith.constant 0 : index
    %c0_5 = arith.constant 0 : index
    %2 = vector.load %arg5[%c0_4, %c0_5] : memref<32x2xf32, #tpu.memory_space<vmem>>, vector<32x2xf32>
    %c0_6 = arith.constant 0 : index
    %c0_7 = arith.constant 0 : index
    %3 = vector.load %arg6[%c0_6, %c0_7] : memref<32x1xf32, #tpu.memory_space<vmem>>, vector<32x1xf32>
    %c0_8 = arith.constant 0 : index
    %c0_9 = arith.constant 0 : index
    %4 = vector.load %arg7[%c0_8, %c0_9] : memref<32x32xf32, #tpu.memory_space<vmem>>, vector<32x32xf32>
    %c0_10 = arith.constant 0 : index
    %c0_11 = arith.constant 0 : index
    %5 = vector.load %arg8[%c0_10, %c0_11] : memref<32x1xf32, #tpu.memory_space<vmem>>, vector<32x1xf32>
    %c0_12 = arith.constant 0 : index
    %6 = memref.load %arg9[%c0_12] : memref<1xf32, #tpu.memory_space<smem>>
    %7 = vector.extract_strided_slice %0 {offsets = [0, 0, 0], sizes = [1, 3, 256], strides = [1, 1, 1]} : vector<2x3x256xf32> to vector<1x3x256xf32>
    %8 = vector.shape_cast %7 : vector<1x3x256xf32> to vector<3x256xf32>
    %9 = vector.extract_strided_slice %8 {offsets = [0, 0], sizes = [1, 256], strides = [1, 1]} : vector<3x256xf32> to vector<1x256xf32>
    %10 = vector.extract_strided_slice %8 {offsets = [1, 0], sizes = [1, 256], strides = [1, 1]} : vector<3x256xf32> to vector<1x256xf32>
    %11 = vector.extract_strided_slice %8 {offsets = [2, 0], sizes = [1, 256], strides = [1, 1]} : vector<3x256xf32> to vector<1x256xf32>
    %cst = arith.constant dense<0.000000e+00> : vector<32x256xf32>
    %12 = tpu.matmul %1, %8, %cst {dimension_numbers = #tpu.dot_dimension_numbers<[1], [0], [0], [1], [0, 0, 1, 1], [], []>} : vector<32x3xf32>, vector<3x256xf32>, vector<32x256xf32> -> vector<32x256xf32>
    %13 = vector.broadcast %3 : vector<32x1xf32> to vector<32x256xf32>
    %14 = arith.addf %12, %13 : vector<32x256xf32>
    %cst_13 = arith.constant 0.000000e+00 : f32
    %15 = vector.broadcast %cst_13 : f32 to vector<32x256xf32>
    %c0_14 = arith.constant 0 : index
    %16 = memref.load %arg2[%c0_14] : memref<64xf32, #tpu.memory_space<smem>>
    %17 = vector.broadcast %16 : f32 to vector<1x256xf32>
    %18 = arith.mulf %17, %9 : vector<1x256xf32>
    %c1 = arith.constant 1 : index
    %19 = memref.load %arg2[%c1] : memref<64xf32, #tpu.memory_space<smem>>
    %20 = vector.broadcast %19 : f32 to vector<1x256xf32>
    %21 = arith.mulf %20, %10 : vector<1x256xf32>
    %22 = arith.addf %18, %21 : vector<1x256xf32>
    %c2 = arith.constant 2 : index
    %23 = memref.load %arg2[%c2] : memref<64xf32, #tpu.memory_space<smem>>
    %24 = vector.broadcast %23 : f32 to vector<1x256xf32>
    %25 = arith.mulf %24, %11 : vector<1x256xf32>
    %26 = arith.addf %22, %25 : vector<1x256xf32>
    %c3 = arith.constant 3 : index
    %27 = memref.load %arg2[%c3] : memref<64xf32, #tpu.memory_space<smem>>
    %28 = vector.broadcast %27 : f32 to vector<1x256xf32>
    %29 = arith.addf %26, %28 : vector<1x256xf32>
    %c4 = arith.constant 4 : index
    %30 = memref.load %arg2[%c4] : memref<64xf32, #tpu.memory_space<smem>>
    %31 = vector.broadcast %30 : f32 to vector<1x256xf32>
    %32 = arith.mulf %31, %9 : vector<1x256xf32>
    %c5 = arith.constant 5 : index
    %33 = memref.load %arg2[%c5] : memref<64xf32, #tpu.memory_space<smem>>
    %34 = vector.broadcast %33 : f32 to vector<1x256xf32>
    %35 = arith.mulf %34, %10 : vector<1x256xf32>
    %36 = arith.addf %32, %35 : vector<1x256xf32>
    %c6 = arith.constant 6 : index
    %37 = memref.load %arg2[%c6] : memref<64xf32, #tpu.memory_space<smem>>
    %38 = vector.broadcast %37 : f32 to vector<1x256xf32>
    %39 = arith.mulf %38, %11 : vector<1x256xf32>
    %40 = arith.addf %36, %39 : vector<1x256xf32>
    %c7 = arith.constant 7 : index
    %41 = memref.load %arg2[%c7] : memref<64xf32, #tpu.memory_space<smem>>
    %42 = vector.broadcast %41 : f32 to vector<1x256xf32>
    %43 = arith.addf %40, %42 : vector<1x256xf32>
    %c12 = arith.constant 12 : index
    %44 = memref.load %arg2[%c12] : memref<64xf32, #tpu.memory_space<smem>>
    %45 = vector.broadcast %44 : f32 to vector<1x256xf32>
    %46 = arith.mulf %45, %9 : vector<1x256xf32>
    %c13 = arith.constant 13 : index
    %47 = memref.load %arg2[%c13] : memref<64xf32, #tpu.memory_space<smem>>
    %48 = vector.broadcast %47 : f32 to vector<1x256xf32>
    %49 = arith.mulf %48, %10 : vector<1x256xf32>
    %50 = arith.addf %46, %49 : vector<1x256xf32>
    %c14 = arith.constant 14 : index
    %51 = memref.load %arg2[%c14] : memref<64xf32, #tpu.memory_space<smem>>
    %52 = vector.broadcast %51 : f32 to vector<1x256xf32>
    %53 = arith.mulf %52, %11 : vector<1x256xf32>
    %54 = arith.addf %50, %53 : vector<1x256xf32>
    %c15 = arith.constant 15 : index
    %55 = memref.load %arg2[%c15] : memref<64xf32, #tpu.memory_space<smem>>
    %56 = vector.broadcast %55 : f32 to vector<1x256xf32>
    %57 = arith.addf %54, %56 : vector<1x256xf32>
    %cst_15 = arith.constant 9.99999993E-9 : f32
    %58 = vector.broadcast %cst_15 : f32 to vector<1x256xf32>
    %59 = arith.addf %57, %58 : vector<1x256xf32>
    %60 = tpu.reciprocal %59 {approx = true} : vector<1x256xf32> -> vector<1x256xf32>
    %61 = arith.mulf %29, %60 : vector<1x256xf32>
    %62 = arith.mulf %43, %60 : vector<1x256xf32>
    %63 = tpu.concatenate %61, %62 in 0 : vector<1x256xf32>, vector<1x256xf32> -> vector<2x256xf32>
    %cst_16 = arith.constant dense<0.000000e+00> : vector<32x256xf32>
    %64 = tpu.matmul %2, %63, %cst_16 {dimension_numbers = #tpu.dot_dimension_numbers<[1], [0], [0], [1], [0, 0, 1, 1], [], []>} : vector<32x2xf32>, vector<2x256xf32>, vector<32x256xf32> -> vector<32x256xf32>
    %65 = arith.addf %14, %64 : vector<32x256xf32>
    %cst_17 = arith.constant 0.000000e+00 : f32
    %66 = vector.broadcast %cst_17 : f32 to vector<32x256xf32>
    %67 = arith.maximumf %65, %66 : vector<32x256xf32>
    %cst_18 = arith.constant dense<0.000000e+00> : vector<32x256xf32>
    %68 = tpu.matmul %4, %67, %cst_18 {dimension_numbers = #tpu.dot_dimension_numbers<[1], [0], [0], [1], [0, 0, 1, 1], [], []>} : vector<32x32xf32>, vector<32x256xf32>, vector<32x256xf32> -> vector<32x256xf32>
    %c0_19 = arith.constant 0 : index
    %c0_20 = arith.constant 0 : index
    %c0_21 = arith.constant 0 : index
    %c0_22 = arith.constant 0 : index
    %69 = vector.load %arg3[%c0_19, %c0_20, %c0_21, %c0_22] : memref<2x2x32x1xf32, #tpu.memory_space<vmem>>, vector<1x1x32x1xf32>
    %70 = vector.shape_cast %69 : vector<1x1x32x1xf32> to vector<32x1xf32>
    %71 = vector.broadcast %70 : vector<32x1xf32> to vector<32x256xf32>
    %72 = arith.addf %68, %71 : vector<32x256xf32>
    %cst_23 = arith.constant 0.000000e+00 : f32
    %73 = vector.broadcast %cst_23 : f32 to vector<32x256xf32>
    %74 = arith.maximumf %72, %73 : vector<32x256xf32>
    %75 = arith.addf %15, %74 : vector<32x256xf32>
    %c32 = arith.constant 32 : index
    %76 = memref.load %arg2[%c32] : memref<64xf32, #tpu.memory_space<smem>>
    %77 = vector.broadcast %76 : f32 to vector<1x256xf32>
    %78 = arith.mulf %77, %9 : vector<1x256xf32>
    %c33 = arith.constant 33 : index
    %79 = memref.load %arg2[%c33] : memref<64xf32, #tpu.memory_space<smem>>
    %80 = vector.broadcast %79 : f32 to vector<1x256xf32>
    %81 = arith.mulf %80, %10 : vector<1x256xf32>
    %82 = arith.addf %78, %81 : vector<1x256xf32>
    %c34 = arith.constant 34 : index
    %83 = memref.load %arg2[%c34] : memref<64xf32, #tpu.memory_space<smem>>
    %84 = vector.broadcast %83 : f32 to vector<1x256xf32>
    %85 = arith.mulf %84, %11 : vector<1x256xf32>
    %86 = arith.addf %82, %85 : vector<1x256xf32>
    %c35 = arith.constant 35 : index
    %87 = memref.load %arg2[%c35] : memref<64xf32, #tpu.memory_space<smem>>
    %88 = vector.broadcast %87 : f32 to vector<1x256xf32>
    %89 = arith.addf %86, %88 : vector<1x256xf32>
    %c36 = arith.constant 36 : index
    %90 = memref.load %arg2[%c36] : memref<64xf32, #tpu.memory_space<smem>>
    %91 = vector.broadcast %90 : f32 to vector<1x256xf32>
    %92 = arith.mulf %91, %9 : vector<1x256xf32>
    %c37 = arith.constant 37 : index
    %93 = memref.load %arg2[%c37] : memref<64xf32, #tpu.memory_space<smem>>
    %94 = vector.broadcast %93 : f32 to vector<1x256xf32>
    %95 = arith.mulf %94, %10 : vector<1x256xf32>
    %96 = arith.addf %92, %95 : vector<1x256xf32>
    %c38 = arith.constant 38 : index
    %97 = memref.load %arg2[%c38] : memref<64xf32, #tpu.memory_space<smem>>
    %98 = vector.broadcast %97 : f32 to vector<1x256xf32>
    %99 = arith.mulf %98, %11 : vector<1x256xf32>
    %100 = arith.addf %96, %99 : vector<1x256xf32>
    %c39 = arith.constant 39 : index
    %101 = memref.load %arg2[%c39] : memref<64xf32, #tpu.memory_space<smem>>
    %102 = vector.broadcast %101 : f32 to vector<1x256xf32>
    %103 = arith.addf %100, %102 : vector<1x256xf32>
    %c44 = arith.constant 44 : index
    %104 = memref.load %arg2[%c44] : memref<64xf32, #tpu.memory_space<smem>>
    %105 = vector.broadcast %104 : f32 to vector<1x256xf32>
    %106 = arith.mulf %105, %9 : vector<1x256xf32>
    %c45 = arith.constant 45 : index
    %107 = memref.load %arg2[%c45] : memref<64xf32, #tpu.memory_space<smem>>
    %108 = vector.broadcast %107 : f32 to vector<1x256xf32>
    %109 = arith.mulf %108, %10 : vector<1x256xf32>
    %110 = arith.addf %106, %109 : vector<1x256xf32>
    %c46 = arith.constant 46 : index
    %111 = memref.load %arg2[%c46] : memref<64xf32, #tpu.memory_space<smem>>
    %112 = vector.broadcast %111 : f32 to vector<1x256xf32>
    %113 = arith.mulf %112, %11 : vector<1x256xf32>
    %114 = arith.addf %110, %113 : vector<1x256xf32>
    %c47 = arith.constant 47 : index
    %115 = memref.load %arg2[%c47] : memref<64xf32, #tpu.memory_space<smem>>
    %116 = vector.broadcast %115 : f32 to vector<1x256xf32>
    %117 = arith.addf %114, %116 : vector<1x256xf32>
    %cst_24 = arith.constant 9.99999993E-9 : f32
    %118 = vector.broadcast %cst_24 : f32 to vector<1x256xf32>
    %119 = arith.addf %117, %118 : vector<1x256xf32>
    %120 = tpu.reciprocal %119 {approx = true} : vector<1x256xf32> -> vector<1x256xf32>
    %121 = arith.mulf %89, %120 : vector<1x256xf32>
    %122 = arith.mulf %103, %120 : vector<1x256xf32>
    %123 = tpu.concatenate %121, %122 in 0 : vector<1x256xf32>, vector<1x256xf32> -> vector<2x256xf32>
    %cst_25 = arith.constant dense<0.000000e+00> : vector<32x256xf32>
    %124 = tpu.matmul %2, %123, %cst_25 {dimension_numbers = #tpu.dot_dimension_numbers<[1], [0], [0], [1], [0, 0, 1, 1], [], []>} : vector<32x2xf32>, vector<2x256xf32>, vector<32x256xf32> -> vector<32x256xf32>
    %125 = arith.addf %14, %124 : vector<32x256xf32>
    %cst_26 = arith.constant 0.000000e+00 : f32
    %126 = vector.broadcast %cst_26 : f32 to vector<32x256xf32>
    %127 = arith.maximumf %125, %126 : vector<32x256xf32>
    %cst_27 = arith.constant dense<0.000000e+00> : vector<32x256xf32>
    %128 = tpu.matmul %4, %127, %cst_27 {dimension_numbers = #tpu.dot_dimension_numbers<[1], [0], [0], [1], [0, 0, 1, 1], [], []>} : vector<32x32xf32>, vector<32x256xf32>, vector<32x256xf32> -> vector<32x256xf32>
    %c1_28 = arith.constant 1 : index
    %c0_29 = arith.constant 0 : index
    %c0_30 = arith.constant 0 : index
    %c0_31 = arith.constant 0 : index
    %129 = vector.load %arg3[%c1_28, %c0_29, %c0_30, %c0_31] : memref<2x2x32x1xf32, #tpu.memory_space<vmem>>, vector<1x1x32x1xf32>
    %130 = vector.shape_cast %129 : vector<1x1x32x1xf32> to vector<32x1xf32>
    %131 = vector.broadcast %130 : vector<32x1xf32> to vector<32x256xf32>
    %132 = arith.addf %128, %131 : vector<32x256xf32>
    %cst_32 = arith.constant 0.000000e+00 : f32
    %133 = vector.broadcast %cst_32 : f32 to vector<32x256xf32>
    %134 = arith.maximumf %132, %133 : vector<32x256xf32>
    %135 = arith.addf %75, %134 : vector<32x256xf32>
    %136 = vector.broadcast %5 : vector<32x1xf32> to vector<32x256xf32>
    %137 = arith.mulf %135, %136 : vector<32x256xf32>
    %cst_33 = arith.constant dense<0.000000e+00> : vector<256xf32>
    %138 = vector.multi_reduction <add>, %137, %cst_33 [0] : vector<32x256xf32> to vector<256xf32>
    %139 = vector.shape_cast %138 : vector<256xf32> to vector<1x256xf32>
    %140 = vector.broadcast %6 : f32 to vector<1x256xf32>
    %141 = arith.addf %139, %140 : vector<1x256xf32>
    %142 = vector.extract_strided_slice %0 {offsets = [1, 0, 0], sizes = [1, 3, 256], strides = [1, 1, 1]} : vector<2x3x256xf32> to vector<1x3x256xf32>
    %143 = vector.shape_cast %142 : vector<1x3x256xf32> to vector<3x256xf32>
    %144 = vector.extract_strided_slice %143 {offsets = [0, 0], sizes = [1, 256], strides = [1, 1]} : vector<3x256xf32> to vector<1x256xf32>
    %145 = vector.extract_strided_slice %143 {offsets = [1, 0], sizes = [1, 256], strides = [1, 1]} : vector<3x256xf32> to vector<1x256xf32>
    %146 = vector.extract_strided_slice %143 {offsets = [2, 0], sizes = [1, 256], strides = [1, 1]} : vector<3x256xf32> to vector<1x256xf32>
    %cst_34 = arith.constant dense<0.000000e+00> : vector<32x256xf32>
    %147 = tpu.matmul %1, %143, %cst_34 {dimension_numbers = #tpu.dot_dimension_numbers<[1], [0], [0], [1], [0, 0, 1, 1], [], []>} : vector<32x3xf32>, vector<3x256xf32>, vector<32x256xf32> -> vector<32x256xf32>
    %148 = vector.broadcast %3 : vector<32x1xf32> to vector<32x256xf32>
    %149 = arith.addf %147, %148 : vector<32x256xf32>
    %cst_35 = arith.constant 0.000000e+00 : f32
    %150 = vector.broadcast %cst_35 : f32 to vector<32x256xf32>
    %c16 = arith.constant 16 : index
    %151 = memref.load %arg2[%c16] : memref<64xf32, #tpu.memory_space<smem>>
    %152 = vector.broadcast %151 : f32 to vector<1x256xf32>
    %153 = arith.mulf %152, %144 : vector<1x256xf32>
    %c17 = arith.constant 17 : index
    %154 = memref.load %arg2[%c17] : memref<64xf32, #tpu.memory_space<smem>>
    %155 = vector.broadcast %154 : f32 to vector<1x256xf32>
    %156 = arith.mulf %155, %145 : vector<1x256xf32>
    %157 = arith.addf %153, %156 : vector<1x256xf32>
    %c18 = arith.constant 18 : index
    %158 = memref.load %arg2[%c18] : memref<64xf32, #tpu.memory_space<smem>>
    %159 = vector.broadcast %158 : f32 to vector<1x256xf32>
    %160 = arith.mulf %159, %146 : vector<1x256xf32>
    %161 = arith.addf %157, %160 : vector<1x256xf32>
    %c19 = arith.constant 19 : index
    %162 = memref.load %arg2[%c19] : memref<64xf32, #tpu.memory_space<smem>>
    %163 = vector.broadcast %162 : f32 to vector<1x256xf32>
    %164 = arith.addf %161, %163 : vector<1x256xf32>
    %c20 = arith.constant 20 : index
    %165 = memref.load %arg2[%c20] : memref<64xf32, #tpu.memory_space<smem>>
    %166 = vector.broadcast %165 : f32 to vector<1x256xf32>
    %167 = arith.mulf %166, %144 : vector<1x256xf32>
    %c21 = arith.constant 21 : index
    %168 = memref.load %arg2[%c21] : memref<64xf32, #tpu.memory_space<smem>>
    %169 = vector.broadcast %168 : f32 to vector<1x256xf32>
    %170 = arith.mulf %169, %145 : vector<1x256xf32>
    %171 = arith.addf %167, %170 : vector<1x256xf32>
    %c22 = arith.constant 22 : index
    %172 = memref.load %arg2[%c22] : memref<64xf32, #tpu.memory_space<smem>>
    %173 = vector.broadcast %172 : f32 to vector<1x256xf32>
    %174 = arith.mulf %173, %146 : vector<1x256xf32>
    %175 = arith.addf %171, %174 : vector<1x256xf32>
    %c23 = arith.constant 23 : index
    %176 = memref.load %arg2[%c23] : memref<64xf32, #tpu.memory_space<smem>>
    %177 = vector.broadcast %176 : f32 to vector<1x256xf32>
    %178 = arith.addf %175, %177 : vector<1x256xf32>
    %c28 = arith.constant 28 : index
    %179 = memref.load %arg2[%c28] : memref<64xf32, #tpu.memory_space<smem>>
    %180 = vector.broadcast %179 : f32 to vector<1x256xf32>
    %181 = arith.mulf %180, %144 : vector<1x256xf32>
    %c29 = arith.constant 29 : index
    %182 = memref.load %arg2[%c29] : memref<64xf32, #tpu.memory_space<smem>>
    %183 = vector.broadcast %182 : f32 to vector<1x256xf32>
    %184 = arith.mulf %183, %145 : vector<1x256xf32>
    %185 = arith.addf %181, %184 : vector<1x256xf32>
    %c30 = arith.constant 30 : index
    %186 = memref.load %arg2[%c30] : memref<64xf32, #tpu.memory_space<smem>>
    %187 = vector.broadcast %186 : f32 to vector<1x256xf32>
    %188 = arith.mulf %187, %146 : vector<1x256xf32>
    %189 = arith.addf %185, %188 : vector<1x256xf32>
    %c31 = arith.constant 31 : index
    %190 = memref.load %arg2[%c31] : memref<64xf32, #tpu.memory_space<smem>>
    %191 = vector.broadcast %190 : f32 to vector<1x256xf32>
    %192 = arith.addf %189, %191 : vector<1x256xf32>
    %cst_36 = arith.constant 9.99999993E-9 : f32
    %193 = vector.broadcast %cst_36 : f32 to vector<1x256xf32>
    %194 = arith.addf %192, %193 : vector<1x256xf32>
    %195 = tpu.reciprocal %194 {approx = true} : vector<1x256xf32> -> vector<1x256xf32>
    %196 = arith.mulf %164, %195 : vector<1x256xf32>
    %197 = arith.mulf %178, %195 : vector<1x256xf32>
    %198 = tpu.concatenate %196, %197 in 0 : vector<1x256xf32>, vector<1x256xf32> -> vector<2x256xf32>
    %cst_37 = arith.constant dense<0.000000e+00> : vector<32x256xf32>
    %199 = tpu.matmul %2, %198, %cst_37 {dimension_numbers = #tpu.dot_dimension_numbers<[1], [0], [0], [1], [0, 0, 1, 1], [], []>} : vector<32x2xf32>, vector<2x256xf32>, vector<32x256xf32> -> vector<32x256xf32>
    %200 = arith.addf %149, %199 : vector<32x256xf32>
    %cst_38 = arith.constant 0.000000e+00 : f32
    %201 = vector.broadcast %cst_38 : f32 to vector<32x256xf32>
    %202 = arith.maximumf %200, %201 : vector<32x256xf32>
    %cst_39 = arith.constant dense<0.000000e+00> : vector<32x256xf32>
    %203 = tpu.matmul %4, %202, %cst_39 {dimension_numbers = #tpu.dot_dimension_numbers<[1], [0], [0], [1], [0, 0, 1, 1], [], []>} : vector<32x32xf32>, vector<32x256xf32>, vector<32x256xf32> -> vector<32x256xf32>
    %c0_40 = arith.constant 0 : index
    %c1_41 = arith.constant 1 : index
    %c0_42 = arith.constant 0 : index
    %c0_43 = arith.constant 0 : index
    %204 = vector.load %arg3[%c0_40, %c1_41, %c0_42, %c0_43] : memref<2x2x32x1xf32, #tpu.memory_space<vmem>>, vector<1x1x32x1xf32>
    %205 = vector.shape_cast %204 : vector<1x1x32x1xf32> to vector<32x1xf32>
    %206 = vector.broadcast %205 : vector<32x1xf32> to vector<32x256xf32>
    %207 = arith.addf %203, %206 : vector<32x256xf32>
    %cst_44 = arith.constant 0.000000e+00 : f32
    %208 = vector.broadcast %cst_44 : f32 to vector<32x256xf32>
    %209 = arith.maximumf %207, %208 : vector<32x256xf32>
    %210 = arith.addf %150, %209 : vector<32x256xf32>
    %c48 = arith.constant 48 : index
    %211 = memref.load %arg2[%c48] : memref<64xf32, #tpu.memory_space<smem>>
    %212 = vector.broadcast %211 : f32 to vector<1x256xf32>
    %213 = arith.mulf %212, %144 : vector<1x256xf32>
    %c49 = arith.constant 49 : index
    %214 = memref.load %arg2[%c49] : memref<64xf32, #tpu.memory_space<smem>>
    %215 = vector.broadcast %214 : f32 to vector<1x256xf32>
    %216 = arith.mulf %215, %145 : vector<1x256xf32>
    %217 = arith.addf %213, %216 : vector<1x256xf32>
    %c50 = arith.constant 50 : index
    %218 = memref.load %arg2[%c50] : memref<64xf32, #tpu.memory_space<smem>>
    %219 = vector.broadcast %218 : f32 to vector<1x256xf32>
    %220 = arith.mulf %219, %146 : vector<1x256xf32>
    %221 = arith.addf %217, %220 : vector<1x256xf32>
    %c51 = arith.constant 51 : index
    %222 = memref.load %arg2[%c51] : memref<64xf32, #tpu.memory_space<smem>>
    %223 = vector.broadcast %222 : f32 to vector<1x256xf32>
    %224 = arith.addf %221, %223 : vector<1x256xf32>
    %c52 = arith.constant 52 : index
    %225 = memref.load %arg2[%c52] : memref<64xf32, #tpu.memory_space<smem>>
    %226 = vector.broadcast %225 : f32 to vector<1x256xf32>
    %227 = arith.mulf %226, %144 : vector<1x256xf32>
    %c53 = arith.constant 53 : index
    %228 = memref.load %arg2[%c53] : memref<64xf32, #tpu.memory_space<smem>>
    %229 = vector.broadcast %228 : f32 to vector<1x256xf32>
    %230 = arith.mulf %229, %145 : vector<1x256xf32>
    %231 = arith.addf %227, %230 : vector<1x256xf32>
    %c54 = arith.constant 54 : index
    %232 = memref.load %arg2[%c54] : memref<64xf32, #tpu.memory_space<smem>>
    %233 = vector.broadcast %232 : f32 to vector<1x256xf32>
    %234 = arith.mulf %233, %146 : vector<1x256xf32>
    %235 = arith.addf %231, %234 : vector<1x256xf32>
    %c55 = arith.constant 55 : index
    %236 = memref.load %arg2[%c55] : memref<64xf32, #tpu.memory_space<smem>>
    %237 = vector.broadcast %236 : f32 to vector<1x256xf32>
    %238 = arith.addf %235, %237 : vector<1x256xf32>
    %c60 = arith.constant 60 : index
    %239 = memref.load %arg2[%c60] : memref<64xf32, #tpu.memory_space<smem>>
    %240 = vector.broadcast %239 : f32 to vector<1x256xf32>
    %241 = arith.mulf %240, %144 : vector<1x256xf32>
    %c61 = arith.constant 61 : index
    %242 = memref.load %arg2[%c61] : memref<64xf32, #tpu.memory_space<smem>>
    %243 = vector.broadcast %242 : f32 to vector<1x256xf32>
    %244 = arith.mulf %243, %145 : vector<1x256xf32>
    %245 = arith.addf %241, %244 : vector<1x256xf32>
    %c62 = arith.constant 62 : index
    %246 = memref.load %arg2[%c62] : memref<64xf32, #tpu.memory_space<smem>>
    %247 = vector.broadcast %246 : f32 to vector<1x256xf32>
    %248 = arith.mulf %247, %146 : vector<1x256xf32>
    %249 = arith.addf %245, %248 : vector<1x256xf32>
    %c63 = arith.constant 63 : index
    %250 = memref.load %arg2[%c63] : memref<64xf32, #tpu.memory_space<smem>>
    %251 = vector.broadcast %250 : f32 to vector<1x256xf32>
    %252 = arith.addf %249, %251 : vector<1x256xf32>
    %cst_45 = arith.constant 9.99999993E-9 : f32
    %253 = vector.broadcast %cst_45 : f32 to vector<1x256xf32>
    %254 = arith.addf %252, %253 : vector<1x256xf32>
    %255 = tpu.reciprocal %254 {approx = true} : vector<1x256xf32> -> vector<1x256xf32>
    %256 = arith.mulf %224, %255 : vector<1x256xf32>
    %257 = arith.mulf %238, %255 : vector<1x256xf32>
    %258 = tpu.concatenate %256, %257 in 0 : vector<1x256xf32>, vector<1x256xf32> -> vector<2x256xf32>
    %cst_46 = arith.constant dense<0.000000e+00> : vector<32x256xf32>
    %259 = tpu.matmul %2, %258, %cst_46 {dimension_numbers = #tpu.dot_dimension_numbers<[1], [0], [0], [1], [0, 0, 1, 1], [], []>} : vector<32x2xf32>, vector<2x256xf32>, vector<32x256xf32> -> vector<32x256xf32>
    %260 = arith.addf %149, %259 : vector<32x256xf32>
    %cst_47 = arith.constant 0.000000e+00 : f32
    %261 = vector.broadcast %cst_47 : f32 to vector<32x256xf32>
    %262 = arith.maximumf %260, %261 : vector<32x256xf32>
    %cst_48 = arith.constant dense<0.000000e+00> : vector<32x256xf32>
    %263 = tpu.matmul %4, %262, %cst_48 {dimension_numbers = #tpu.dot_dimension_numbers<[1], [0], [0], [1], [0, 0, 1, 1], [], []>} : vector<32x32xf32>, vector<32x256xf32>, vector<32x256xf32> -> vector<32x256xf32>
    %c1_49 = arith.constant 1 : index
    %c1_50 = arith.constant 1 : index
    %c0_51 = arith.constant 0 : index
    %c0_52 = arith.constant 0 : index
    %264 = vector.load %arg3[%c1_49, %c1_50, %c0_51, %c0_52] : memref<2x2x32x1xf32, #tpu.memory_space<vmem>>, vector<1x1x32x1xf32>
    %265 = vector.shape_cast %264 : vector<1x1x32x1xf32> to vector<32x1xf32>
    %266 = vector.broadcast %265 : vector<32x1xf32> to vector<32x256xf32>
    %267 = arith.addf %263, %266 : vector<32x256xf32>
    %cst_53 = arith.constant 0.000000e+00 : f32
    %268 = vector.broadcast %cst_53 : f32 to vector<32x256xf32>
    %269 = arith.maximumf %267, %268 : vector<32x256xf32>
    %270 = arith.addf %210, %269 : vector<32x256xf32>
    %271 = vector.broadcast %5 : vector<32x1xf32> to vector<32x256xf32>
    %272 = arith.mulf %270, %271 : vector<32x256xf32>
    %cst_54 = arith.constant dense<0.000000e+00> : vector<256xf32>
    %273 = vector.multi_reduction <add>, %272, %cst_54 [0] : vector<32x256xf32> to vector<256xf32>
    %274 = vector.shape_cast %273 : vector<256xf32> to vector<1x256xf32>
    %275 = vector.broadcast %6 : f32 to vector<1x256xf32>
    %276 = arith.addf %274, %275 : vector<1x256xf32>
    %277 = tpu.concatenate %141, %276 in 0 : vector<1x256xf32>, vector<1x256xf32> -> vector<2x256xf32>
    %c0_55 = arith.constant 0 : index
    %c0_56 = arith.constant 0 : index
    %278 = vector.load %arg10[%c0_55, %c0_56] : memref<2x256xf32, #tpu.memory_space<vmem>>, vector<2x256xf32>
    tpu.vector_store %arg10[%c0_55, %c0_56], %277 {strides = array<i32>} : memref<2x256xf32, #tpu.memory_space<vmem>>, vector<2x256xf32>,
    return
  }
  func.func @transform_0(%arg0: i32) -> (i32, i32, i32) {
    %c0_i32 = arith.constant 0 : i32
    %c0_i32_0 = arith.constant 0 : i32
    %c0_i32_1 = arith.constant 0 : i32
    return %c0_i32, %c0_i32_0, %arg0 : i32, i32, i32
  }
  func.func @transform_1(%arg0: i32) -> i32 {
    %c0_i32 = arith.constant 0 : i32
    %c0_i32_0 = arith.constant 0 : i32
    return %c0_i32 : i32
  }
  func.func @transform_2(%arg0: i32) -> (i32, i32, i32, i32) {
    %c0_i32 = arith.constant 0 : i32
    %c0_i32_0 = arith.constant 0 : i32
    %c0_i32_1 = arith.constant 0 : i32
    %c0_i32_2 = arith.constant 0 : i32
    %c0_i32_3 = arith.constant 0 : i32
    return %c0_i32, %c0_i32_0, %c0_i32_1, %c0_i32_2 : i32, i32, i32, i32
  }
  func.func @transform_3(%arg0: i32) -> (i32, i32) {
    %c0_i32 = arith.constant 0 : i32
    %c0_i32_0 = arith.constant 0 : i32
    %c0_i32_1 = arith.constant 0 : i32
    return %c0_i32, %c0_i32_0 : i32, i32
  }
  func.func @transform_4(%arg0: i32) -> (i32, i32) {
    %c0_i32 = arith.constant 0 : i32
    %c0_i32_0 = arith.constant 0 : i32
    %c0_i32_1 = arith.constant 0 : i32
    return %c0_i32, %c0_i32_0 : i32, i32
  }
  func.func @transform_5(%arg0: i32) -> (i32, i32) {
    %c0_i32 = arith.constant 0 : i32
    %c0_i32_0 = arith.constant 0 : i32
    %c0_i32_1 = arith.constant 0 : i32
    return %c0_i32, %c0_i32_0 : i32, i32
  }
  func.func @transform_6(%arg0: i32) -> (i32, i32) {
    %c0_i32 = arith.constant 0 : i32
    %c0_i32_0 = arith.constant 0 : i32
    %c0_i32_1 = arith.constant 0 : i32
    return %c0_i32, %c0_i32_0 : i32, i32
  }
  func.func @transform_7(%arg0: i32) -> (i32, i32) {
    %c0_i32 = arith.constant 0 : i32
    %c0_i32_0 = arith.constant 0 : i32
    %c0_i32_1 = arith.constant 0 : i32
    return %c0_i32, %c0_i32_0 : i32, i32
  }
  func.func @transform_8(%arg0: i32) -> i32 {
    %c0_i32 = arith.constant 0 : i32
    %c0_i32_0 = arith.constant 0 : i32
    return %c0_i32 : i32
  }
  func.func @transform_9(%arg0: i32) -> (i32, i32) {
    %c0_i32 = arith.constant 0 : i32
    %c0_i32_0 = arith.constant 0 : i32
    return %c0_i32, %arg0 : i32, i32
  }
}

</mosaic_0001>

<bundles_post_ra>
// kernel: tpu_custom_call.1
= control target key start
LH: loop header
LB: loop body
LE: loop exit
PB: predicated region body
PF: predicated region fallthrough
CT: control target
= control target key end

     0   :  { %15 = vsyncpa [#allocation5], 0  ;;  %s2677_s0 = inlined_call_operand.vmem [shape: f32[2,3,256], index: 0, kind: input, shape index: {}]   ;;  %s2678_s1 = inlined_call_operand.vmem [shape: f32[64], index: 1, kind: input, shape index: {}]   ;;  %s2679_s2 = inlined_call_operand.vmem [shape: f32[2,2,32,1], index: 2, kind: input, shape index: {}]   ;;  %s2680_s3 = inlined_call_operand.vmem [shape: f32[32,3], index: 3, kind: input, shape index: {}]   ;;  %s2681_s4 = inlined_call_operand.vmem [shape: f32[32,2], index: 4, kind: input, shape index: {}]   ;;  %s2682_s5 = inlined_call_operand.vmem [shape: f32[32,1], index: 5, kind: input, shape index: {}]   ;;  %s2683_s6 = inlined_call_operand.vmem [shape: f32[32,32], index: 6, kind: input, shape index: {}]   ;;  %s2684_s7 = inlined_call_operand.vmem [shape: f32[32,1], index: 7, kind: input, shape index: {}]   ;;  %s2685_s8 = inlined_call_operand.<no memory space> [shape: f32[1], index: 8, kind: input, shape index: {}]   ;;  %s2686_s9 = inlined_call_operand.hbm [shape: f32[2,256], index: 9, kind: output, shape index: {}]  }
   0x1   :  { %16 = vsyncpa [#allocation4], 0  ;;  %s25_s11 = sshll.u32 %s2678_s1, 4  ;;  %s26_s11 = int_to_ptr.vmem [resolvable:$true] %s25_s11 }
   0x2   :  { %s1951_s12 = scalar_lea.vmem %s26_s11, 16  ;;  %p1956_p1 = scmp.lt.s32.totalorder %s26_s11, %s26_s11 }
   0x3   :  { %p1952_p0 = scmp.ne.s32.totalorder %s26_s11, %s1951_s12  ;;  %p1957_p2 = scmp.lt.s32.totalorder %s1951_s12, %s1951_s12 }
   0x5   :  { %p1958_p3 = por %p1957_p2, %p1956_p1 }
   0x7   :  { %p1959_p4 = pnand %p1958_p3, %p1952_p0 }
   0x9   :  { %1962 = shalt.err (!%p1959_p4)
}
   0xa   :  { %s1989_s13 = smov [#allocation3]  }
   0xb   :  { %28 = dma.vmem_to_smem %s26_s11, 16, %s1989_s13, [#allocation5]  }
   0xc   :  { %1985 = dma.done.wait [#allocation5], 16  }
   0xd   :  { %1986 = vsyncadd [#allocation5], 4294967280 }
   0xe   :  { %46 = sfence }
   0xf   :  { %v2049_v0 = vld [vmem:[%s2677_s0] sm:$0x77]  ;;  %vm105_vm0 = vcmask 1042432   ;;  %v1990_v2 = vmov 0.0   ;;  %vm92_vm1 = vcmask 23552   ;;  %s2063_s17 = sld [smem:[#allocation3 + $0x1]]  ;;  %v270_v63 = vlaneseq }
  0x10   :  { %v91_v1 = vcombine.high %v2049_v0, %v2049_v0  ;;  %174 = vmatprep.mubr.f32.mxu0 %v1990_v2  ;;  %378 = vmatprep.mubr.f32.mxu1 %v1990_v2  ;;  %v2058_v3 = vld [vmem:[%s2680_s3] sm:$0xff]  ;;  %s2065_s18 = sld [smem:[#allocation3 + $0x5]]  ;;  %s1784_s19 = sld [smem:[#allocation3 + $0xc]]  ;;  %v2073_v4 = vld [vmem:[%s2680_s3 + $0x8] sm:$0xff]  ;;  %v1991_v5 = vmov 0   ;;  %v2094_v7 = vld [vmem:[%s2680_s3 + $0x10] sm:$0xff] }
  0x11   :  { %s1785_s20 = sld [smem:[#allocation3 + $0xd]]  ;;  %s2075_s23 = sld [smem:[#allocation3 + $0x2]]  ;;  %1939 = vset.pattern.permute.xlu0 %v1991_v5  ;;  %1940 = vset.pattern.permute.xlu1 %v1991_v5  ;;  %v57_v6 = vld [vmem:[%s2682_s5] sm:$0xff]  ;;  %v59_v8 = vld [vmem:[%s2682_s5 + $0x10] sm:$0xff]  ;;  %v58_v10 = vld [vmem:[%s2682_s5 + $0x8] sm:$0xff]  ;;  %vm291_vm2 = vcmask 1040384  }
  0x12   :  { %1767 = vmatprep.subr.msk.mxu0 %vm105_vm0, %v91_v1  ;;  %s1787_s24 = sld [smem:[#allocation3 + $0xe]]  ;;  %s2077_s25 = sld [smem:[#allocation3]]  ;;  %72 = vperm.xlu0 %1939, %v57_v6   ;;  %v60_v13 = vld [vmem:[%s2682_s5 + $0x18] sm:$0xff]  ;;  %v419_v23 = vld [vmem:[%s2679_s2] sm:$0xff]  ;;  %v420_v28 = vld [vmem:[%s2679_s2 + $0x8] sm:$0xff]  ;;  %vm307_vm3 = vcmask 1041408  }
  0x13   :  { %1768 = vmatpush1.msk.msra.mxu0 %vm105_vm0, %v2049_v0  ;;  %s2079_s26 = sld [smem:[#allocation3 + $0x6]]  ;;  %s2083_s27 = sld [smem:[#allocation3 + $0x4]]  ;;  %82 = vperm.xlu1 %1940, %v59_v8   ;;  %v2127_v20 = vld [vmem:[%s2680_s3 + $0x18] sm:$0xff]  ;;  %v1824_v37 = vld [vmem:[%s2679_s2 + $0x40] sm:$0xff]  ;;  %v1825_v41 = vld [vmem:[%s2679_s2 + $0x48] sm:$0xff]  ;;  %vm294_vm4 = vcmask 15360  }
  0x14   :  { %1769 = vmatmul.mubr.msk.f32.vlgmr.msra.gmra.mrb[0].mxu0 %vm92_vm1, %v2058_v3  ;;  %s2088_s30 = sld [smem:[#allocation3 + $0xf]]  ;;  %s2103_s1 = sld [smem:[#allocation3 + $0x2c]]  ;;  %v1862_v54 = vld [vmem:[%s2679_s2 + $0x20] sm:$0xff]  ;;  %v1863_v59 = vld [vmem:[%s2679_s2 + $0x28] sm:$0xff]  ;;  %vm443_vm5 = vcmask 261120  }
  0x15   :  { %180 = vmatprep.mubr.f32.mxu0 %v1990_v2  ;;  %v203_v11 = vstv %s2063_s17  ;;  %s2115_s17 = sld [smem:[#allocation3 + $0x2d]]  ;;  %s2121_s5 = sld [smem:[#allocation3 + $0x2e]] }
  0x16   :  { %v244_v9 = vstv %s1784_s19  ;;  %v225_v14 = vstv %s2065_s18  ;;  %s2113_s19 = sld [smem:[#allocation3 + $0x21]]  ;;  %77 = vperm.xlu0 %1939, %v58_v10   ;;  %v204_v21 = vmul.f32 %v203_v11, %v2049_v0  ;;  %s2136_s28 = sld [smem:[#allocation3 + $0x20]] }
  0x17   :  { %v247_v12 = vstv %s1785_s20  ;;  %v245_v15 = vmul.f32 %v244_v9, %v2049_v0  ;;  %v211_v18 = vstv %s2075_s23  ;;  %s2119_s20 = sld [smem:[#allocation3 + $0x25]]  ;;  %87 = vperm.xlu1 %1940, %v60_v13   ;;  %v226_v25 = vmul.f32 %v225_v14, %v2049_v0  ;;  %s2138_s29 = sld [smem:[#allocation3 + $0x22]] }
  0x18   :  { %1770 = vmatmul.mubr.msk.f32.gmra.mrb[2].mxu0 %vm92_vm1, %v2073_v4  ;;  %v248_v16 = vmul.f32 %v247_v12, %v2049_v0  ;;  %v255_v17 = vstv %s1787_s24  ;;  %v200_v24 = vstv %s2077_s25  ;;  %v212_v29 = vmul.f32 %v211_v18, %v2049_v0  ;;  %s2144_s11 = sld [smem:[#allocation3 + $0x3]]  ;;  %s2150_s25 = sld [smem:[#allocation3 + $0x24]]  ;;  %v1894_v12 = vld [vmem:[%s2679_s2 + $0x60] sm:$0xff] }
  0x19   :  { %186 = vmatprep.mubr.f32.mxu0 %v1990_v2  ;;  %v256_v19 = vmul.f32 %v255_v17, %v2049_v0  ;;  %v233_v26 = vstv %s2079_s26  ;;  %v222_v30 = vstv %s2083_s27  ;;  %s2152_s26 = sld [smem:[#allocation3 + $0x26]]  ;;  %v201_v33 = vmul.f32 %v200_v24, %v2049_v0  ;;  %s2157_s27 = sld [smem:[#allocation3 + $0x7]]  ;;  %v1895_v17 = vld [vmem:[%s2679_s2 + $0x68] sm:$0xff] }
  0x1a   :  { %v1786_v22 = vrot.slane %v248_v16, 9  ;;  %v263_v32 = vstv %s2088_s30  ;;  %425 = vperm.xlu0 %1939, %v419_v23   ;;  %v1774_v34 = vrot.slane %v204_v21, 9  ;;  %v234_v35 = vmul.f32 %v233_v26, %v2049_v0  ;;  %s2159_s30 = sld [smem:[#allocation3 + $0x2f]]  ;;  %s2199_s22 = sld [smem:[#allocation3 + $0x23]] }
  0x1b   :  { %v1788_v27 = vrot.slane %v256_v19, 10  ;;  %430 = vperm.xlu1 %1940, %v420_v28   ;;  %v223_v38 = vmul.f32 %v222_v30, %v2049_v0  ;;  %v1780_v39 = vrot.slane %v226_v25, 9  ;;  %v606_v40 = vstv %s2103_s1  ;;  %s2203_s23 = sld [smem:[#allocation3 + $0x27]]  ;;  %v421_v25 = vld [vmem:[%s2679_s2 + $0x10] sm:$0xff]  ;;  %s1882_s13 = sld [smem:[#allocation3 + $0x3c]] }
  0x1c   :  { %1771 = vmatmul.mubr.msk.f32.gmra.mrb[4].mxu0 %vm92_vm1, %v2094_v7  ;;  %v253_v31 = vadd.f32 %v1786_v22, %v245_v15  ;;  %v1776_v42 = vrot.slane %v212_v29, 10  ;;  %v565_v44 = vstv %s2113_s19  ;;  %v609_v45 = vstv %s2115_s17  ;;  %v1826_v29 = vld [vmem:[%s2679_s2 + $0x50] sm:$0xff]  ;;  %s1855_s12 = sld [smem:[#allocation3 + $0x1f]]  ;;  %s1885_s14 = sld [smem:[#allocation3 + $0x3e]] }
  0x1d   :  { %192 = vmatprep.mubr.f32.mxu0 %v1990_v2  ;;  %v587_v46 = vstv %s2119_s20  ;;  %v607_v47 = vmul.f32 %v606_v40, %v2049_v0  ;;  %v610_v48 = vmul.f32 %v609_v45, %v2049_v0  ;;  %v617_v49 = vstv %s2121_s5  ;;  %s2340_s15 = sld [smem:[#allocation3 + $0x11]]  ;;  %s2342_s1 = sld [smem:[#allocation3 + $0x15]] }
  0x1e   :  { %v261_v36 = vadd.f32 %v1788_v27, %v253_v31  ;;  %773 = vperm.xlu0 %1939, %v1824_v37   ;;  %v209_v50 = vadd.f32 %v1774_v34, %v201_v33  ;;  %v1782_v51 = vrot.slane %v234_v35, 10  ;;  %v618_v53 = vmul.f32 %v617_v49, %v2049_v0  ;;  %s2344_s16 = sld [smem:[#allocation3 + $0x10]]  ;;  %s2349_s21 = sld [smem:[#allocation3 + $0x12]] }
  0x1f   :  { %778 = vperm.xlu1 %1940, %v1825_v41   ;;  %v231_v55 = vadd.f32 %v1780_v39, %v223_v38  ;;  %v562_v56 = vstv %s2136_s28  ;;  %v573_v57 = vstv %s2138_s29  ;;  %v1814_v58 = vrot.slane %v610_v48, 9  ;;  %v1896_v39 = vld [vmem:[%s2679_s2 + $0x70] sm:$0xff]  ;;  %v422_v48 = vld [vmem:[%s2679_s2 + $0x18] sm:$0xff]  ;;  %s2355_s19 = sld [smem:[#allocation3 + $0x14]]  ;;  %s2360_s17 = sld [smem:[#allocation3 + $0x16]] }
  0x20   :  { %1772 = vmatmul.mubr.msk.f32.gmra.mrb[6].mxu0 %vm92_vm1, %v2127_v20  ;;  %v264_v43 = vadd.f32 %v263_v32, %v261_v36  ;;  %v566_v60 = vmul.f32 %v565_v44, %v2049_v0  ;;  %v588_v61 = vmul.f32 %v587_v46, %v2049_v0  ;;  %v1816_v62 = vrot.slane %v618_v53, 10  ;;  %v1864_v36 = vld [vmem:[%s2679_s2 + $0x30] sm:$0xff]  ;;  %s2364_s20 = sld [smem:[#allocation3 + $0x3f]]  ;;  %s2369_s5 = sld [smem:[#allocation3 + $0x31]] }
  0x21   :  { %520 = vmatprep.mubr.f32.mxu0 %v1990_v2  ;;  %v584_v1 = vstv %s2150_s25  ;;  %v595_v5 = vstv %s2152_s26  ;;  %v615_v6 = vadd.f32 %v1814_v58, %v607_v47  ;;  %v217_v8 = vadd.f32 %v1776_v42, %v209_v50  ;;  %s2377_s18 = sld [smem:[#allocation3 + $0x35]]  ;;  %s2414_s24 = sld [smem:[#allocation3 + $0x13]] }
  0x22   :  { %v265_v52 = vadd.f32 1e-08, %v264_v43  ;;  %1252 = vperm.xlu0 %1939, %v1862_v54   ;;  %v219_v9 = vstv %s2144_s11  ;;  %v241_v10 = vstv %s2157_s27  ;;  %v625_v11 = vstv %s2159_s30  ;;  %s1853_s27 = sld [smem:[#allocation3 + $0x1e]]  ;;  %s1883_s30 = sld [smem:[#allocation3 + $0x3d]] }
  0x23   :  { %1257 = vperm.xlu1 %1940, %v1863_v59   ;;  %v239_v13 = vadd.f32 %v1782_v51, %v231_v55  ;;  %v563_v14 = vmul.f32 %v562_v56, %v2049_v0  ;;  %v574_v15 = vmul.f32 %v573_v57, %v2049_v0  ;;  %v623_v16 = vadd.f32 %v1816_v62, %v615_v6  ;;  %v2235_v51 = vld [vmem:[%s2681_s4] sm:$0xff]  ;;  %v1865_v55 = vld [vmem:[%s2679_s2 + $0x38] sm:$0xff]  ;;  %v2251_v57 = vld [vmem:[%s2681_s4 + $0x8] sm:$0xff]  ;;  %s2417_s28 = sld [smem:[#allocation3 + $0x17]]  ;;  %s2441_s29 = sld [smem:[#allocation3 + $0x33]] }
  0x24   :  { %1943 = vrcp.f32 %v265_v52  ;;  %v1802_v18 = vrot.slane %v566_v60, 9  ;;  %v585_v19 = vmul.f32 %v584_v1, %v2049_v0  ;;  %v1808_v21 = vrot.slane %v588_v61, 9  ;;  %v1827_v52 = vld [vmem:[%s2679_s2 + $0x58] sm:$0xff]  ;;  %v2256_v60 = vld [vmem:[%s2677_s0 + $0x8] sm:$0x77]  ;;  %v65_v6 = vld [vmem:[%s2684_s7] sm:$0xff] }
  0x25   :  { %v596_v22 = vmul.f32 %v595_v5, %v2049_v0  ;;  %v271_v23 = vshrl.u32 %v270_v63, 7  ;;  %v626_v24 = vadd.f32 %v625_v11, %v623_v16  ;;  %v220_v26 = vadd.f32 %v219_v9, %v217_v8  ;;  %v1897_v61 = vld [vmem:[%s2679_s2 + $0x78] sm:$0xff]  ;;  %v2278_v11 = vld [vmem:[%s2681_s4 + $0x10] sm:$0xff]  ;;  %s2389_s0 = sld [smem:[#allocation3 + $0x34]]  ;;  %s2396_s2 = sld [smem:[#allocation3 + $0x36]] }
  0x26   :  { %1587 = vperm.xlu0 %1939, %v1894_v12   ;;  %v242_v27 = vadd.f32 %v241_v10, %v239_v13  ;;  %v571_v30 = vadd.f32 %v1802_v18, %v563_v14  ;;  %v1804_v31 = vrot.slane %v574_v15, 10  ;;  %v593_v0 = vadd.f32 %v1808_v21, %v585_v19  ;;  %v66_v12 = vld [vmem:[%s2684_s7 + $0x8] sm:$0xff]  ;;  %v67_v13 = vld [vmem:[%s2684_s7 + $0x10] sm:$0xff]  ;;  %v2295_v14 = vld [vmem:[%s2681_s4 + $0x18] sm:$0xff]  ;;  %s1851_s4 = sld [smem:[#allocation3 + $0x1d]]  ;;  %s2444_s3 = sld [smem:[#allocation3 + $0x37]] }
  0x27   :  { %1592 = vperm.xlu1 %1940, %v1895_v17   ;;  %v627_v28 = vadd.f32 1e-08, %v626_v24  ;;  %v1810_v32 = vrot.slane %v596_v22, 10  ;;  %v2211_v33 = vsub.s32 4, %v271_v23  ;;  %v2213_v34 = vsub.s32 0, %v271_v23  ;;  %v68_v15 = vld [vmem:[%s2684_s7 + $0x18] sm:$0xff] }
  0x28   :  { %v579_v40 = vadd.f32 %v1804_v31, %v571_v30  ;;  %v581_v41 = vstv %s2199_s22  ;;  %v603_v43 = vstv %s2203_s23  ;;  %v946_v8 = vcombine.high %v2256_v60, %v2256_v60  ;;  %s1850_s7 = sld [smem:[#allocation3 + $0x1c]]  ;;  %s2383_s22 = sld [smem:[#allocation3 + $0x30]] }
  0x29   :  { %1945 = vrcp.f32 %v627_v28  ;;  %v601_v42 = vadd.f32 %v1810_v32, %v593_v0  ;;  %v1096_v24 = vstv %s1853_s27  ;;  %v1423_v30 = vstv %s1883_s30  ;;  %s2387_s23 = sld [smem:[#allocation3 + $0x32]] }
  0x2a   :  { %435 = vperm.xlu0 %1939, %v421_v25   ;;  %v582_v53 = vadd.f32 %v581_v41, %v579_v40  ;;  %v1104_v0 = vstv %s1855_s12  ;;  %v1044_v40 = vstv %s2340_s15 }
  0x2b   :  { %783 = vperm.xlu1 %1940, %v1826_v29   ;;  %v604_v54 = vadd.f32 %v603_v43, %v601_v42 }
  0x2c   :  { %v1088_v22 = vstv %s1851_s4 }
  0x2e   :  { %v1944_v35 = vpop.eup %1943  ;;  %1262 = vperm.xlu0 %1939, %v1864_v36   ;;  %v1085_v23 = vstv %s1850_s7  ;;  %v1420_v36 = vstv %s1882_s13  ;;  %s1992_s13 = smov [#allocation6]  }
  0x2f   :  { %v267_v37 = vmul.f32 %v1944_v35, %v220_v26  ;;  %v268_v38 = vmul.f32 %v1944_v35, %v242_v27  ;;  %1597 = vperm.xlu1 %1940, %v1896_v39   ;;  %v1086_v25 = vmul.f32 %v1085_v23, %v2256_v60  ;;  %v1097_v27 = vmul.f32 %v1096_v24, %v2256_v60 }
  0x30   :  { %v1424_v35 = vmul.f32 %v1423_v30, %v2256_v60  ;;  %v1421_v42 = vmul.f32 %v1420_v36, %v2256_v60 }
  0x31   :  { %v277_v44 = vrot.slane %v267_v37, %v2211_v33  ;;  %v288_v45 = vrot.slane %v268_v38, %v2211_v33  ;;  %v273_v46 = vrot.slane %v267_v37, %v2213_v34  ;;  %v284_v47 = vrot.slane %v268_v38, %v2213_v34 }
  0x32   :  { %440 = vperm.xlu0 %1939, %v422_v48   ;;  %v1854_v29 = vrot.slane %v1097_v27, 10  ;;  %v1431_v37 = vstv %s1885_s14  ;;  %v1884_v43 = vrot.slane %v1424_v35, 9  ;;  %s1758_s14 = sshll.u32 %s1992_s13, 4  ;;  %s1759_s14 = int_to_ptr.vmem [resolvable:$true] %s1758_s14 }
  0x33   :  { %v293_v49 = vsel %vm291_vm2, %v277_v44, %v288_v45  ;;  %v292_v50 = vsel %vm291_vm2, %v273_v46, %v284_v47  ;;  %788 = vperm.xlu1 %1940, %v1827_v52   ;;  %v1946_v56 = vpop.eup %1945  ;;  %v1432_v44 = vmul.f32 %v1431_v37, %v2256_v60  ;;  %v1066_v47 = vstv %s2342_s1  ;;  %s1963_s15 = scalar_lea.vmem %s1759_s14, 64  ;;  %p1968_p6 = scmp.lt.s32.totalorder %s1759_s14, %s1759_s14 }
  0x34   :  { %1790 = vmatprep.subr.msk.mxu1 %vm307_vm3, %v293_v49  ;;  %v629_v58 = vmul.f32 %v1946_v56, %v582_v53  ;;  %v630_v59 = vmul.f32 %v1946_v56, %v604_v54  ;;  %v1041_v53 = vstv %s2344_s16  ;;  %v1045_v54 = vmul.f32 %v1044_v40, %v2256_v60  ;;  %p1964_p5 = scmp.ne.s32.totalorder %s1759_s14, %s1963_s15  ;;  %p1969_p7 = scmp.lt.s32.totalorder %s1963_s15, %s1963_s15 }
  0x35   :  { %1791 = vmatpush1.msk.msra.mxu1 %vm307_vm3, %v292_v50  ;;  %v1376_v40 = vstv %s2383_s22 }
  0x36   :  { %1792 = vmatmul.mubr.msk.f32.vlgmr.msra.gmra.mrb[0].mxu1 %vm294_vm4, %v2235_v51  ;;  %1267 = vperm.xlu0 %1939, %v1865_v55   ;;  %v639_v62 = vrot.slane %v629_v58, %v2211_v33  ;;  %v650_v63 = vrot.slane %v630_v59, %v2211_v33  ;;  %v635_v1 = vrot.slane %v629_v58, %v2213_v34  ;;  %p1970_p8 = por %p1969_p7, %p1968_p6 }
  0x37   :  { %384 = vmatprep.mubr.f32.mxu1 %v1990_v2  ;;  %v646_v5 = vrot.slane %v630_v59, %v2213_v34  ;;  %1602 = vperm.xlu1 %1940, %v1897_v61   ;;  %v1429_v58 = vadd.f32 %v1884_v43, %v1421_v42  ;;  %v1886_v59 = vrot.slane %v1432_v44, 10  ;;  %v1387_v44 = vstv %s2387_s23 }
  0x38   :  { %v654_v9 = vsel %vm291_vm2, %v639_v62, %v650_v63  ;;  %v1052_v62 = vstv %s2349_s21  ;;  %v1067_v63 = vmul.f32 %v1066_v47, %v2256_v60  ;;  %p1971_p9 = pnand %p1970_p8, %p1964_p5 }
  0x39   :  { %v653_v10 = vsel %vm291_vm2, %v635_v1, %v646_v5  ;;  %1818 = vmatprep.subr.msk.mxu1 %vm307_vm3, %v654_v9  ;;  %v1840_v9 = vrot.slane %v1045_v54, 9  ;;  %v1053_v24 = vmul.f32 %v1052_v62, %v2256_v60  ;;  %v1409_v54 = vstv %s2396_s2 }
  0x3a   :  { %1793 = vmatmul.mubr.msk.f32.gmra.mrb[2].mxu1 %vm294_vm4, %v2251_v57  ;;  %898 = vperm.xlu0 %1939, %v65_v6  }
  0x3b   :  { %390 = vmatprep.mubr.f32.mxu1 %v1990_v2  ;;  %1819 = vmatpush1.msk.msra.mxu1 %vm307_vm3, %v653_v10  ;;  %v1063_v10 = vstv %s2355_s19 }
  0x3c   :  { %1832 = vmatprep.subr.msk.mxu1 %vm105_vm0, %v946_v8  ;;  %903 = vperm.xlu1 %1940, %v66_v12   ;;  %v1042_v8 = vmul.f32 %v1041_v53, %v2256_v60  ;;  %v1064_v27 = vmul.f32 %v1063_v10, %v2256_v60 }
  0x3e   :  { %1794 = vmatmul.mubr.msk.f32.gmra.mrb[4].mxu1 %vm294_vm4, %v2278_v11  ;;  %908 = vperm.xlu0 %1939, %v67_v13  }
  0x3f   :  { %396 = vmatprep.mubr.f32.mxu1 %v1990_v2 }
  0x40   :  { %913 = vperm.xlu1 %1940, %v68_v15   ;;  %v1074_v15 = vstv %s2360_s17 }
  0x42   :  { %1795 = vmatmul.mubr.msk.f32.gmra.mrb[6].mxu1 %vm294_vm4, %v2295_v14 }
  0x43   :  { %725 = vmatprep.mubr.f32.mxu1 %v1990_v2 }
  0x46   :  { %1820 = vmatmul.mubr.msk.f32.vlgmr.msra.gmra.mrb[8].mxu1 %vm294_vm4, %v2235_v51 }
  0x47   :  { %731 = vmatprep.mubr.f32.mxu1 %v1990_v2  ;;  %1833 = vmatpush1.msk.msra.mxu1 %vm105_vm0, %v2256_v60 }
  0x4a   :  { %1821 = vmatmul.mubr.msk.f32.gmra.mrb[10].mxu1 %vm294_vm4, %v2251_v57 }
  0x4b   :  { %737 = vmatprep.mubr.f32.mxu1 %v1990_v2 }
  0x4e   :  { %1822 = vmatmul.mubr.msk.f32.gmra.mrb[12].mxu1 %vm294_vm4, %v2278_v11 }
  0x4f   :  { %743 = vmatprep.mubr.f32.mxu1 %v1990_v2 }
  0x52   :  { %1823 = vmatmul.mubr.msk.f32.gmra.mrb[14].mxu1 %vm294_vm4, %v2295_v14 }
  0x53   :  { %1015 = vmatprep.mubr.f32.mxu1 %v1990_v2 }
  0x56   :  { %1834 = vmatmul.mubr.msk.f32.vlgmr.msra.gmra.mrb[16].mxu1 %vm92_vm1, %v2058_v3 }
  0x57   :  { %1021 = vmatprep.mubr.f32.mxu1 %v1990_v2 }
  0x5a   :  { %1835 = vmatmul.mubr.msk.f32.gmra.mrb[18].mxu1 %vm92_vm1, %v2073_v4 }
  0x5b   :  { %1027 = vmatprep.mubr.f32.mxu1 %v1990_v2 }
  0x5e   :  { %1836 = vmatmul.mubr.msk.f32.gmra.mrb[20].mxu1 %vm92_vm1, %v2094_v7 }
  0x5f   :  { %1033 = vmatprep.mubr.f32.mxu1 %v1990_v2 }
  0x62   :  { %1837 = vmatmul.mubr.msk.f32.gmra.mrb[22].mxu1 %vm92_vm1, %v2127_v20  ;;  %v1089_v20 = vmul.f32 %v1088_v22, %v2256_v60  ;;  %v1439_v22 = vstv %s2364_s20 }
  0x63   :  { %1334 = vmatprep.mubr.f32.mxu1 %v1990_v2 }
  0x64   :  { %v1852_v26 = vrot.slane %v1089_v20, 9 }
  0x66   :  { %v1094_v28 = vadd.f32 %v1852_v26, %v1086_v25  ;;  %v1379_v25 = vstv %s2369_s5 }
  0x67   :  { %v1380_v42 = vmul.f32 %v1379_v25, %v2256_v60  ;;  %v1082_v25 = vstv %s2417_s28 }
  0x68   :  { %v1102_v31 = vadd.f32 %v1854_v29, %v1094_v28  ;;  %v1846_v28 = vrot.slane %v1067_v63, 9  ;;  %v1401_v29 = vstv %s2377_s18 }
  0x69   :  { %v1402_v47 = vmul.f32 %v1401_v29, %v2256_v60 }
  0x6a   :  { %v1105_v38 = vadd.f32 %v1104_v0, %v1102_v31  ;;  %v1075_v0 = vmul.f32 %v1074_v15, %v2256_v60  ;;  %v1072_v53 = vadd.f32 %v1846_v28, %v1064_v27 }
  0x6b   :  { %v1878_v10 = vrot.slane %v1402_v47, 9 }
  0x6c   :  { %v1106_v48 = vadd.f32 1e-08, %v1105_v38  ;;  %v1050_v38 = vadd.f32 %v1840_v9, %v1042_v8 }
  0x6e   :  { %1947 = vrcp.f32 %v1106_v48 }
  0x91   :  { %v2346_v32 = vpop.permute.xlu0 %72 }
  0x92   :  { %v2391_v1 = vpop.permute.xlu1 %82 }
  0x95   :  { %v2366_v45 = vpop.permute.xlu0 %77 }
  0x96   :  { %v2419_v36 = vpop.permute.xlu1 %87 }
  0xe7   :  { %v176_v16 = vpop.f32.mrb[0].mxu0 }
  0xe8   :  { %v178_v17 = vpop.f32.mrb[1].mxu0  ;;  %v2352_v39 = vadd.f32 %v176_v16, %v2346_v32  ;;  %v1437_v16 = vadd.f32 %v1886_v59, %v1429_v58 }
  0xe9   :  { %v2358_v41 = vadd.f32 %v178_v17, %v2346_v32 }
  0xea   :  { %v1440_v35 = vadd.f32 %v1439_v22, %v1437_v16 }
  0xeb   :  { %v182_v3 = vpop.f32.mrb[2].mxu0 }
  0xec   :  { %v184_v18 = vpop.f32.mrb[3].mxu0  ;;  %v2372_v49 = vadd.f32 %v182_v3, %v2366_v45  ;;  %v1441_v62 = vadd.f32 1e-08, %v1440_v35 }
  0xed   :  { %v2380_v55 = vadd.f32 %v184_v18, %v2366_v45 }
  0xee   :  { %1949 = vrcp.f32 %v1441_v62 }
  0xef   :  { %v2329_v19 = vpop.f32.mrb[4].mxu0 }
  0xf0   :  { %v2331_v4 = vpop.f32.mrb[5].mxu0  ;;  %v2400_v12 = vadd.f32 %v2329_v19, %v2391_v1 }
  0xf1   :  { %v2406_v18 = vadd.f32 %v2331_v4, %v2391_v1 }
  0xf3   :  { %v2333_v21 = vpop.f32.mrb[6].mxu0 }
  0xf4   :  { %v2335_v7 = vpop.f32.mrb[7].mxu0  ;;  %v2426_v43 = vadd.f32 %v2333_v21, %v2419_v36  ;;  %v1848_v21 = vrot.slane %v1075_v0, 10  ;;  %v2454_v0 = vld [vmem:[%s2683_s6] sm:$0xff] }
  0xf5   :  { %v2433_v48 = vadd.f32 %v2335_v7, %v2419_v36  ;;  %v1388_v7 = vmul.f32 %v1387_v44, %v2256_v60 }
  0xf6   :  { %v1080_v27 = vadd.f32 %v1848_v21, %v1072_v53 }
  0xf7   :  { %v1874_v29 = vrot.slane %v1388_v7, 10 }
 0x109   :  { %v380_v46 = vpop.f32.mrb[0].mxu1 }
 0x10a   :  { %v403_v50 = vadd.f32 %v380_v46, %v2352_v39  ;;  %v382_v52 = vpop.f32.mrb[1].mxu1  ;;  %v1398_v46 = vstv %s2389_s0 }
 0x10b   :  { %v404_v56 = vadd.f32 %v382_v52, %v2358_v41  ;;  %v1842_v52 = vrot.slane %v1053_v24, 10  ;;  %v1060_v24 = vstv %s2414_s24 }
 0x10c   :  { %v411_v17 = vmax.f32 %v403_v50, 0.0 }
 0x10d   :  { %v386_v61 = vpop.f32.mrb[2].mxu1  ;;  %v412_v20 = vmax.f32 %v404_v56, 0.0  ;;  %v1948_v56 = vpop.eup %1947 }
 0x10e   :  { %v405_v5 = vadd.f32 %v386_v61, %v2372_v49  ;;  %v388_v6 = vpop.f32.mrb[3].mxu1  ;;  %v1377_v61 = vmul.f32 %v1376_v40, %v2256_v60  ;;  %v1950_v7 = vpop.eup %1949 }
 0x10f   :  { %v406_v13 = vadd.f32 %v388_v6, %v2380_v55  ;;  %v1399_v6 = vmul.f32 %v1398_v46, %v2256_v60 }
 0x110   :  { %v413_v3 = vmax.f32 %v405_v5, 0.0  ;;  %v1872_v5 = vrot.slane %v1380_v42, 9 }
 0x111   :  { %v414_v23 = vmax.f32 %v406_v13, 0.0  ;;  %v392_v26 = vpop.f32.mrb[4].mxu1  ;;  %v1410_v13 = vmul.f32 %v1409_v54, %v2256_v60  ;;  %v1407_v60 = vadd.f32 %v1878_v10, %v1399_v6 }
 0x112   :  { %v1905_v19 = vpack.c.bf16 %v413_v3, %v411_v17  ;;  %v407_v31 = vadd.f32 %v392_v26, %v2400_v12  ;;  %v394_v4 = vpop.f32.mrb[5].mxu1  ;;  %v1058_v3 = vadd.f32 %v1842_v52, %v1050_v38  ;;  %v1385_v28 = vadd.f32 %v1872_v5, %v1377_v61 }
 0x113   :  { %v1903_v30 = vpack.c.bf16 %v414_v23, %v412_v20  ;;  %v408_v37 = vadd.f32 %v394_v4, %v2406_v18  ;;  %v1417_v52 = vstv %s2444_s3 }
 0x114   :  { %v415_v8 = vmax.f32 %v407_v31, 0.0  ;;  %v1061_v35 = vadd.f32 %v1060_v24, %v1058_v3  ;;  %v1393_v42 = vadd.f32 %v1874_v29, %v1385_v28 }
 0x115   :  { %1904 = vmatprep.subr.bf16.mxu0 %v1903_v30  ;;  %v398_v50 = vpop.f32.mrb[6].mxu1  ;;  %v416_v15 = vmax.f32 %v408_v37, 0.0  ;;  %v1880_v30 = vrot.slane %v1410_v13, 10  ;;  %v1083_v37 = vadd.f32 %v1082_v25, %v1080_v27 }
 0x116   :  { %1906 = vmatpush1.bf16.msra.mxu0 %v1905_v19  ;;  %v409_v58 = vadd.f32 %v398_v50, %v2426_v43  ;;  %v400_v59 = vpop.f32.mrb[7].mxu1  ;;  %v1395_v50 = vstv %s2441_s29  ;;  %v1108_v61 = vmul.f32 %v1948_v56, %v1061_v35 }
 0x117   :  { %v410_v63 = vadd.f32 %v400_v59, %v2433_v48  ;;  %v1415_v44 = vadd.f32 %v1880_v30, %v1407_v60  ;;  %v1109_v62 = vmul.f32 %v1948_v56, %v1083_v37 }
 0x118   :  { %v417_v9 = vmax.f32 %v409_v58, 0.0  ;;  %v1114_v25 = vrot.slane %v1108_v61, %v2213_v34 }
 0x119   :  { %v418_v16 = vmax.f32 %v410_v63, 0.0  ;;  %v727_v17 = vpop.f32.mrb[8].mxu1  ;;  %v1396_v63 = vadd.f32 %v1395_v50, %v1393_v42  ;;  %v1418_v5 = vadd.f32 %v1417_v52, %v1415_v44  ;;  %v1129_v10 = vrot.slane %v1109_v62, %v2211_v33 }
 0x11a   :  { %v1909_v22 = vpack.c.bf16 %v417_v9, %v415_v8  ;;  %v750_v20 = vadd.f32 %v727_v17, %v2352_v39  ;;  %v729_v23 = vpop.f32.mrb[9].mxu1  ;;  %v1118_v9 = vrot.slane %v1108_v61, %v2211_v33 }
 0x11b   :  { %v1907_v19 = vpack.c.bf16 %v418_v16, %v416_v15  ;;  %v751_v26 = vadd.f32 %v729_v23, %v2358_v41  ;;  %v1443_v16 = vmul.f32 %v1950_v7, %v1396_v63  ;;  %v1444_v17 = vmul.f32 %v1950_v7, %v1418_v5 }
 0x11c   :  { %v758_v38 = vmax.f32 %v750_v20, 0.0 }
 0x11d   :  { %1908 = vmatprep.subr.bf16.mxu0 %v1907_v19  ;;  %v733_v31 = vpop.f32.mrb[10].mxu1  ;;  %v759_v46 = vmax.f32 %v751_v26, 0.0  ;;  %v1125_v19 = vrot.slane %v1109_v62, %v2213_v34  ;;  %v1133_v26 = vsel %vm291_vm2, %v1118_v9, %v1129_v10  ;;  %v1453_v27 = vrot.slane %v1443_v16, %v2211_v33 }
 0x11e   :  { %v752_v4 = vadd.f32 %v733_v31, %v2372_v49  ;;  %1910 = vmatpush1.bf16.msra.mxu0 %v1909_v22  ;;  %v735_v39 = vpop.f32.mrb[11].mxu1  ;;  %v1464_v28 = vrot.slane %v1444_v17, %v2211_v33  ;;  %v1449_v35 = vrot.slane %v1443_v16, %v2213_v34  ;;  %v1460_v37 = vrot.slane %v1444_v17, %v2213_v34  ;;  %v426_v34 = vpop.permute.xlu0 %425 }
 0x11f   :  { %v753_v41 = vadd.f32 %v735_v39, %v2380_v55  ;;  %v2466_v55 = vld [vmem:[%s2683_s6 + $0x8] sm:$0xff]  ;;  %v1132_v30 = vsel %vm291_vm2, %v1114_v25, %v1125_v19 }
 0x120   :  { %v760_v40 = vmax.f32 %v752_v4, 0.0  ;;  %v1468_v31 = vsel %vm291_vm2, %v1453_v27, %v1464_v28 }
 0x121   :  { %v761_v49 = vmax.f32 %v753_v41, 0.0  ;;  %1796 = vmatmul.mubr.msk.f32.vlgmr.msra.gmra.mrb[8].mxu0 %vm443_vm5, %v2454_v0  ;;  %v739_v47 = vpop.f32.mrb[12].mxu1 }
 0x122   :  { %v1913_v53 = vpack.c.bf16 %v760_v40, %v758_v38  ;;  %v754_v54 = vadd.f32 %v739_v47, %v2400_v12  ;;  %v741_v58 = vpop.f32.mrb[13].mxu1  ;;  %526 = vmatprep.mubr.f32.mxu0 %v1990_v2  ;;  %v1467_v38 = vsel %vm291_vm2, %v1449_v35, %v1460_v37  ;;  %v431_v40 = vpop.permute.xlu1 %430 }
 0x123   :  { %v1911_v59 = vpack.c.bf16 %v761_v49, %v759_v46  ;;  %v755_v21 = vadd.f32 %v741_v58, %v2406_v18  ;;  %v2476_v18 = vld [vmem:[%s2683_s6 + $0x10] sm:$0xff]  ;;  %v774_v42 = vpop.permute.xlu0 %773 }
 0x124   :  { %v762_v13 = vmax.f32 %v754_v54, 0.0 }
 0x125   :  { %1797 = vmatmul.mubr.msk.f32.gmra.mrb[10].mxu0 %vm443_vm5, %v2466_v55  ;;  %v745_v12 = vpop.f32.mrb[14].mxu1  ;;  %1912 = vmatprep.subr.bf16.mxu0 %v1911_v59 }
 0x126   :  { %v756_v6 = vadd.f32 %v745_v12, %v2426_v43  ;;  %v747_v8 = vpop.f32.mrb[15].mxu1  ;;  %1914 = vmatpush1.bf16.msra.mxu0 %v1913_v53  ;;  %532 = vmatprep.mubr.f32.mxu0 %v1990_v2  ;;  %v763_v43 = vmax.f32 %v755_v21, 0.0  ;;  %v779_v44 = vpop.permute.xlu1 %778 }
 0x127   :  { %v757_v56 = vadd.f32 %v747_v8, %v2433_v48  ;;  %v2491_v48 = vld [vmem:[%s2683_s6 + $0x18] sm:$0xff] }
 0x128   :  { %v764_v15 = vmax.f32 %v756_v6, 0.0 }
 0x129   :  { %v765_v3 = vmax.f32 %v757_v56, 0.0  ;;  %1798 = vmatmul.mubr.msk.f32.gmra.mrb[12].mxu0 %vm443_vm5, %v2476_v18  ;;  %v2483_v22 = vpop.f32.mrb[16].mxu1 }
 0x12a   :  { %v1917_v20 = vpack.c.bf16 %v764_v15, %v762_v13  ;;  %v2485_v23 = vpop.f32.mrb[17].mxu1  ;;  %538 = vmatprep.mubr.f32.mxu0 %v1990_v2  ;;  %v2559_v46 = vpop.permute.xlu1 %1257 }
 0x12b   :  { %v1915_v24 = vpack.c.bf16 %v765_v3, %v763_v43 }
 0x12d   :  { %1799 = vmatmul.mubr.msk.f32.gmra.mrb[14].mxu0 %vm443_vm5, %v2491_v48  ;;  %1916 = vmatprep.subr.bf16.mxu0 %v1915_v24  ;;  %v2500_v29 = vpop.f32.mrb[18].mxu1 }
 0x12e   :  { %1918 = vmatpush1.bf16.msra.mxu0 %v1917_v20  ;;  %v2502_v60 = vpop.f32.mrb[19].mxu1  ;;  %855 = vmatprep.mubr.f32.mxu0 %v1990_v2 }
 0x12f   :  { %1856 = vmatprep.subr.msk.mxu0 %vm307_vm3, %v1133_v26 }
 0x131   :  { %1828 = vmatmul.mubr.msk.f32.vlgmr.msra.gmra.mrb[16].mxu0 %vm443_vm5, %v2454_v0  ;;  %v2510_v33 = vpop.f32.mrb[20].mxu1 }
 0x132   :  { %v2512_v4 = vpop.f32.mrb[21].mxu1  ;;  %861 = vmatprep.mubr.f32.mxu0 %v1990_v2  ;;  %1857 = vmatpush1.msk.msra.mxu0 %vm307_vm3, %v1132_v30 }
 0x133   :  { %1888 = vmatprep.subr.msk.mxu0 %vm307_vm3, %v1468_v31 }
 0x135   :  { %1829 = vmatmul.mubr.msk.f32.gmra.mrb[18].mxu0 %vm443_vm5, %v2466_v55  ;;  %v2519_v39 = vpop.f32.mrb[22].mxu1 }
 0x136   :  { %v2521_v41 = vpop.f32.mrb[23].mxu1  ;;  %867 = vmatprep.mubr.f32.mxu0 %v1990_v2 }
 0x139   :  { %1830 = vmatmul.mubr.msk.f32.gmra.mrb[20].mxu0 %vm443_vm5, %v2476_v18 }
 0x13a   :  { %873 = vmatprep.mubr.f32.mxu0 %v1990_v2 }
 0x13d   :  { %1831 = vmatmul.mubr.msk.f32.gmra.mrb[22].mxu0 %vm443_vm5, %v2491_v48 }
 0x13e   :  { %1204 = vmatprep.mubr.f32.mxu0 %v1990_v2 }
 0x141   :  { %1858 = vmatmul.mubr.msk.f32.vlgmr.msra.gmra.mrb[24].mxu0 %vm294_vm4, %v2235_v51 }
 0x142   :  { %1210 = vmatprep.mubr.f32.mxu0 %v1990_v2  ;;  %1889 = vmatpush1.msk.msra.mxu0 %vm307_vm3, %v1467_v38 }
 0x145   :  { %1859 = vmatmul.mubr.msk.f32.gmra.mrb[26].mxu0 %vm294_vm4, %v2251_v57 }
 0x146   :  { %1216 = vmatprep.mubr.f32.mxu0 %v1990_v2 }
 0x149   :  { %1860 = vmatmul.mubr.msk.f32.gmra.mrb[28].mxu0 %vm294_vm4, %v2278_v11 }
 0x14a   :  { %1222 = vmatprep.mubr.f32.mxu0 %v1990_v2 }
 0x14d   :  { %1861 = vmatmul.mubr.msk.f32.gmra.mrb[30].mxu0 %vm294_vm4, %v2295_v14 }
 0x14e   :  { %1539 = vmatprep.mubr.f32.mxu0 %v1990_v2 }
 0x151   :  { %1890 = vmatmul.mubr.msk.f32.vlgmr.msra.gmra.mrb[32].mxu0 %vm294_vm4, %v2235_v51  ;;  %v2557_v51 = vpop.permute.xlu0 %1252 }
 0x152   :  { %1545 = vmatprep.mubr.f32.mxu0 %v1990_v2 }
 0x155   :  { %1891 = vmatmul.mubr.msk.f32.gmra.mrb[34].mxu0 %vm294_vm4, %v2251_v57  ;;  %v2561_v49 = vpop.permute.xlu0 %1587  ;;  %v2563_v57 = vpop.permute.xlu1 %1592 }
 0x156   :  { %1551 = vmatprep.mubr.f32.mxu0 %v1990_v2 }
 0x159   :  { %1892 = vmatmul.mubr.msk.f32.gmra.mrb[36].mxu0 %vm294_vm4, %v2278_v11  ;;  %v436_v47 = vpop.permute.xlu0 %435  ;;  %v784_v52 = vpop.permute.xlu1 %783 }
 0x15a   :  { %1557 = vmatprep.mubr.f32.mxu0 %v1990_v2 }
 0x15d   :  { %1893 = vmatmul.mubr.msk.f32.gmra.mrb[38].mxu0 %vm294_vm4, %v2295_v14  ;;  %v2565_v58 = vpop.permute.xlu0 %1262  ;;  %v2567_v14 = vpop.permute.xlu1 %1597 }
 0x161   :  { %v441_v61 = vpop.permute.xlu0 %440  ;;  %v789_v5 = vpop.permute.xlu1 %788 }
 0x165   :  { %v2569_v9 = vpop.permute.xlu0 %1267  ;;  %v2571_v17 = vpop.permute.xlu1 %1602 }
 0x169   :  { %v2573_v38 = vpop.permute.xlu0 %898 }
 0x1f4   :  { %v522_v50 = vpop.f32.mrb[8].mxu0 }
 0x1f5   :  { %v524_v11 = vpop.f32.mrb[9].mxu0  ;;  %v523_v7 = vadd.f32 %v522_v50, %v426_v34 }
 0x1f6   :  { %v525_v12 = vadd.f32 %v524_v11, %v426_v34 }
 0x1f7   :  { %v545_v13 = vmax.f32 %v523_v7, 0.0 }
 0x1f8   :  { %v528_v53 = vpop.f32.mrb[10].mxu0  ;;  %v546_v43 = vmax.f32 %v525_v12, 0.0 }
 0x1f9   :  { %v530_v54 = vpop.f32.mrb[11].mxu0  ;;  %v529_v15 = vadd.f32 %v528_v53, %v431_v40 }
 0x1fa   :  { %v531_v3 = vadd.f32 %v530_v54, %v431_v40  ;;  %v2575_v40 = vpop.permute.xlu1 %903 }
 0x1fb   :  { %v547_v35 = vmax.f32 %v529_v15, 0.0 }
 0x1fc   :  { %v534_v59 = vpop.f32.mrb[12].mxu0  ;;  %v548_v34 = vmax.f32 %v531_v3, 0.0 }
 0x1fd   :  { %v536_v21 = vpop.f32.mrb[13].mxu0  ;;  %v535_v27 = vadd.f32 %v534_v59, %v436_v47 }
 0x1fe   :  { %v537_v28 = vadd.f32 %v536_v21, %v436_v47 }
 0x1ff   :  { %v549_v54 = vmax.f32 %v535_v27, 0.0 }
 0x200   :  { %v540_v62 = vpop.f32.mrb[14].mxu0  ;;  %v550_v12 = vmax.f32 %v537_v28, 0.0  ;;  %v1020_v28 = vadd.f32 %v2485_v23, %v2346_v32 }
 0x201   :  { %v542_v63 = vpop.f32.mrb[15].mxu0  ;;  %v541_v59 = vadd.f32 %v540_v62, %v441_v61 }
 0x203   :  { %v551_v27 = vmax.f32 %v541_v59, 0.0 }
 0x204   :  { %v857_v6 = vpop.f32.mrb[16].mxu0 }
 0x205   :  { %v858_v8 = vadd.f32 %v857_v6, %v774_v42  ;;  %v859_v56 = vpop.f32.mrb[17].mxu0 }
 0x206   :  { %v860_v10 = vadd.f32 %v859_v56, %v774_v42  ;;  %v543_v56 = vadd.f32 %v542_v63, %v441_v61 }
 0x207   :  { %v880_v16 = vmax.f32 %v858_v8, 0.0 }
 0x208   :  { %v881_v20 = vmax.f32 %v860_v10, 0.0  ;;  %v863_v24 = vpop.f32.mrb[18].mxu0 }
 0x209   :  { %v888_v25 = vadd.f32 %v880_v16, %v545_v13  ;;  %v864_v19 = vadd.f32 %v863_v24, %v779_v44  ;;  %v865_v26 = vpop.f32.mrb[19].mxu0 }
 0x20a   :  { %v889_v30 = vadd.f32 %v881_v20, %v546_v43  ;;  %v866_v31 = vadd.f32 %v865_v26, %v779_v44 }
 0x20b   :  { %v882_v37 = vmax.f32 %v864_v19, 0.0  ;;  %v916_v47 = vmul.f32 %v2573_v38, %v888_v25  ;;  %v2581_v19 = vpop.permute.xlu0 %908  ;;  %v1018_v25 = vadd.f32 %v2483_v22, %v2346_v32  ;;  %v1026_v32 = vadd.f32 %v2502_v60, %v2366_v45 }
 0x20c   :  { %v883_v42 = vmax.f32 %v866_v31, 0.0  ;;  %v869_v50 = vpop.f32.mrb[20].mxu0  ;;  %v917_v10 = vmul.f32 %v2573_v38, %v889_v30  ;;  %v552_v30 = vmax.f32 %v543_v56, 0.0  ;;  %v1030_v56 = vadd.f32 %v2510_v33, %v2391_v1 }
 0x20d   :  { %v890_v11 = vadd.f32 %v882_v37, %v547_v35  ;;  %v870_v53 = vadd.f32 %v869_v50, %v784_v52  ;;  %v871_v7 = vpop.f32.mrb[21].mxu0 }
 0x20e   :  { %v891_v6 = vadd.f32 %v883_v42, %v548_v34  ;;  %v872_v8 = vadd.f32 %v871_v7, %v784_v52 }
 0x20f   :  { %v918_v44 = vmul.f32 %v2575_v40, %v890_v11  ;;  %v884_v21 = vmax.f32 %v870_v53, 0.0 }
 0x210   :  { %v919_v13 = vmul.f32 %v2575_v40, %v891_v6  ;;  %v885_v15 = vmax.f32 %v872_v8, 0.0  ;;  %v875_v16 = vpop.f32.mrb[22].mxu0 }
 0x211   :  { %v924_v43 = vadd.f32 %v918_v44, %v916_v47  ;;  %v892_v3 = vadd.f32 %v884_v21, %v549_v54  ;;  %v876_v20 = vadd.f32 %v875_v16, %v789_v5  ;;  %v877_v24 = vpop.f32.mrb[23].mxu0  ;;  %v1024_v54 = vadd.f32 %v2500_v29, %v2366_v45 }
 0x212   :  { %v933_v52 = vadd.f32 %v919_v13, %v917_v10  ;;  %v893_v62 = vadd.f32 %v885_v15, %v550_v12  ;;  %v878_v26 = vadd.f32 %v877_v24, %v789_v5  ;;  %v2589_v5 = vpop.permute.xlu1 %913  ;;  %v1032_v13 = vadd.f32 %v2512_v4, %v2391_v1 }
 0x213   :  { %v920_v61 = vmul.f32 %v2581_v19, %v892_v3  ;;  %v886_v63 = vmax.f32 %v876_v20, 0.0 }
 0x214   :  { %v921_v31 = vmul.f32 %v2581_v19, %v893_v62  ;;  %v887_v35 = vmax.f32 %v878_v26, 0.0  ;;  %v1206_v37 = vpop.f32.mrb[24].mxu0  ;;  %v1038_v62 = vadd.f32 %v2521_v41, %v2419_v36 }
 0x215   :  { %v925_v34 = vadd.f32 %v924_v43, %v920_v61  ;;  %v894_v42 = vadd.f32 %v886_v63, %v551_v27  ;;  %v1229_v50 = vadd.f32 %v1206_v37, %v1018_v25  ;;  %v1208_v11 = vpop.f32.mrb[25].mxu0 }
 0x216   :  { %v934_v53 = vadd.f32 %v933_v52, %v921_v31  ;;  %v895_v22 = vadd.f32 %v887_v35, %v552_v30  ;;  %v1230_v7 = vadd.f32 %v1208_v11, %v1020_v28  ;;  %v1036_v52 = vadd.f32 %v2519_v39, %v2419_v36 }
 0x217   :  { %v922_v12 = vmul.f32 %v2589_v5, %v894_v42  ;;  %v1237_v10 = vmax.f32 %v1229_v50, 0.0 }
 0x218   :  { %v923_v23 = vmul.f32 %v2589_v5, %v895_v22  ;;  %v1212_v6 = vpop.f32.mrb[26].mxu0  ;;  %v1238_v15 = vmax.f32 %v1230_v7, 0.0 }
 0x219   :  { %v2597_v8 = vadd.f32 %v925_v34, %v922_v12  ;;  %v1231_v59 = vadd.f32 %v1212_v6, %v1024_v54  ;;  %v1214_v47 = vpop.f32.mrb[27].mxu0 }
 0x21a   :  { %v2599_v44 = vadd.f32 %v934_v53, %v923_v23  ;;  %v1232_v21 = vadd.f32 %v1214_v47, %v1026_v32 }
 0x21b   :  { %v1239_v29 = vmax.f32 %v1231_v59, 0.0 }
 0x21c   :  { %v1240_v45 = vmax.f32 %v1232_v21, 0.0  ;;  %v1218_v60 = vpop.f32.mrb[28].mxu0 }
 0x21d   :  { %v1921_v16 = vpack.c.bf16 %v1239_v29, %v1237_v10  ;;  %v1233_v43 = vadd.f32 %v1218_v60, %v1030_v56  ;;  %v1220_v3 = vpop.f32.mrb[29].mxu0 }
 0x21e   :  { %v1919_v20 = vpack.c.bf16 %v1240_v45, %v1238_v15  ;;  %v1234_v24 = vadd.f32 %v1220_v3, %v1032_v13 }
 0x21f   :  { %v1241_v4 = vmax.f32 %v1233_v43, 0.0 }
 0x220   :  { %v1224_v33 = vpop.f32.mrb[30].mxu0  ;;  %1920 = vmatprep.subr.bf16.mxu1 %v1919_v20  ;;  %v1242_v63 = vmax.f32 %v1234_v24, 0.0 }
 0x221   :  { %v1235_v26 = vadd.f32 %v1224_v33, %v1036_v52  ;;  %v1226_v27 = vpop.f32.mrb[31].mxu0  ;;  %1922 = vmatpush1.bf16.msra.mxu1 %v1921_v16 }
 0x222   :  { %v1236_v1 = vadd.f32 %v1226_v27, %v1038_v62 }
 0x223   :  { %v1243_v61 = vmax.f32 %v1235_v26, 0.0 }
 0x224   :  { %v1244_v30 = vmax.f32 %v1236_v1, 0.0  ;;  %v1541_v31 = vpop.f32.mrb[32].mxu0 }
 0x225   :  { %v1925_v35 = vpack.c.bf16 %v1243_v61, %v1241_v4  ;;  %v1564_v37 = vadd.f32 %v1541_v31, %v1018_v25  ;;  %v1543_v34 = vpop.f32.mrb[33].mxu0 }
 0x226   :  { %v1923_v42 = vpack.c.bf16 %v1244_v30, %v1242_v63  ;;  %v1565_v50 = vadd.f32 %v1543_v34, %v1020_v28 }
 0x227   :  { %v1572_v53 = vmax.f32 %v1564_v37, 0.0 }
 0x228   :  { %1924 = vmatprep.subr.bf16.mxu1 %v1923_v42  ;;  %v1547_v39 = vpop.f32.mrb[34].mxu0  ;;  %v1573_v7 = vmax.f32 %v1565_v50, 0.0 }
 0x229   :  { %v1566_v11 = vadd.f32 %v1547_v39, %v1024_v54  ;;  %1926 = vmatpush1.bf16.msra.mxu1 %v1925_v35  ;;  %v1549_v36 = vpop.f32.mrb[35].mxu0 }
 0x22a   :  { %v1567_v41 = vadd.f32 %v1549_v36, %v1026_v32 }
 0x22b   :  { %v1574_v22 = vmax.f32 %v1566_v11, 0.0 }
 0x22c   :  { %v1575_v12 = vmax.f32 %v1567_v41, 0.0  ;;  %1866 = vmatmul.mubr.msk.f32.vlgmr.msra.gmra.mrb[24].mxu1 %vm443_vm5, %v2454_v0  ;;  %v1553_v23 = vpop.f32.mrb[36].mxu0 }
 0x22d   :  { %v1929_v6 = vpack.c.bf16 %v1574_v22, %v1572_v53  ;;  %v1568_v59 = vadd.f32 %v1553_v23, %v1030_v56  ;;  %v1555_v25 = vpop.f32.mrb[37].mxu0  ;;  %1340 = vmatprep.mubr.f32.mxu1 %v1990_v2  ;;  %v936_v22 = vrot.slane %v2599_v44, 4 }
 0x22e   :  { %v1927_v28 = vpack.c.bf16 %v1575_v12, %v1573_v7  ;;  %v1569_v47 = vadd.f32 %v1555_v25, %v1032_v13 }
 0x22f   :  { %v1576_v29 = vmax.f32 %v1568_v59, 0.0 }
 0x230   :  { %1867 = vmatmul.mubr.msk.f32.gmra.mrb[26].mxu1 %vm443_vm5, %v2466_v55  ;;  %v1559_v54 = vpop.f32.mrb[38].mxu0  ;;  %1928 = vmatprep.subr.bf16.mxu1 %v1927_v28  ;;  %v1577_v45 = vmax.f32 %v1569_v47, 0.0 }
 0x231   :  { %v1570_v32 = vadd.f32 %v1559_v54, %v1036_v52  ;;  %v1561_v21 = vpop.f32.mrb[39].mxu0  ;;  %1930 = vmatpush1.bf16.msra.mxu1 %v1929_v6  ;;  %1346 = vmatprep.mubr.f32.mxu1 %v1990_v2 }
 0x232   :  { %v1571_v10 = vadd.f32 %v1561_v21, %v1038_v62 }
 0x233   :  { %v1578_v15 = vmax.f32 %v1570_v32, 0.0 }
 0x234   :  { %v1579_v56 = vmax.f32 %v1571_v10, 0.0  ;;  %1868 = vmatmul.mubr.msk.f32.gmra.mrb[28].mxu1 %vm443_vm5, %v2476_v18 }
 0x235   :  { %v1933_v60 = vpack.c.bf16 %v1578_v15, %v1576_v29  ;;  %1352 = vmatprep.mubr.f32.mxu1 %v1990_v2 }
 0x236   :  { %v1931_v13 = vpack.c.bf16 %v1579_v56, %v1577_v45 }
 0x238   :  { %1869 = vmatmul.mubr.msk.f32.gmra.mrb[30].mxu1 %vm443_vm5, %v2491_v48  ;;  %1932 = vmatprep.subr.bf16.mxu1 %v1931_v13 }
 0x239   :  { %1934 = vmatpush1.bf16.msra.mxu1 %v1933_v60  ;;  %1669 = vmatprep.mubr.f32.mxu1 %v1990_v2 }
 0x23c   :  { %1898 = vmatmul.mubr.msk.f32.vlgmr.msra.gmra.mrb[32].mxu1 %vm443_vm5, %v2454_v0 }
 0x23d   :  { %1675 = vmatprep.mubr.f32.mxu1 %v1990_v2 }
 0x240   :  { %1899 = vmatmul.mubr.msk.f32.gmra.mrb[34].mxu1 %vm443_vm5, %v2466_v55 }
 0x241   :  { %1681 = vmatprep.mubr.f32.mxu1 %v1990_v2 }
 0x244   :  { %1900 = vmatmul.mubr.msk.f32.gmra.mrb[36].mxu1 %vm443_vm5, %v2476_v18 }
 0x245   :  { %1687 = vmatprep.mubr.f32.mxu1 %v1990_v2 }
 0x248   :  { %1901 = vmatmul.mubr.msk.f32.gmra.mrb[38].mxu1 %vm443_vm5, %v2491_v48 }
 0x2ff   :  { %v1336_v16 = vpop.f32.mrb[24].mxu1 }
 0x300   :  { %v1338_v43 = vpop.f32.mrb[25].mxu1  ;;  %v1337_v55 = vadd.f32 %v1336_v16, %v2557_v51 }
 0x301   :  { %v1339_v33 = vadd.f32 %v1338_v43, %v2557_v51 }
 0x302   :  { %v1359_v1 = vmax.f32 %v1337_v55, 0.0 }
 0x303   :  { %v1342_v3 = vpop.f32.mrb[26].mxu1  ;;  %v1360_v61 = vmax.f32 %v1339_v33, 0.0 }
 0x304   :  { %v1344_v20 = vpop.f32.mrb[27].mxu1  ;;  %v1343_v48 = vadd.f32 %v1342_v3, %v2559_v46 }
 0x305   :  { %v1345_v63 = vadd.f32 %v1344_v20, %v2559_v46  ;;  %v927_v46 = vrot.slane %v2597_v8, 4 }
 0x306   :  { %v1361_v39 = vmax.f32 %v1343_v48, 0.0 }
 0x307   :  { %v1348_v0 = vpop.f32.mrb[28].mxu1  ;;  %v1362_v36 = vmax.f32 %v1345_v63, 0.0  ;;  %v928_v3 = vadd.f32 %v927_v46, %v2597_v8 }
 0x308   :  { %v1350_v24 = vpop.f32.mrb[29].mxu1  ;;  %v1349_v51 = vadd.f32 %v1348_v0, %v2565_v58 }
 0x309   :  { %v1351_v42 = vadd.f32 %v1350_v24, %v2565_v58 }
 0x30a   :  { %v1363_v6 = vmax.f32 %v1349_v51, 0.0 }
 0x30b   :  { %v1354_v52 = vpop.f32.mrb[30].mxu1  ;;  %v1364_v59 = vmax.f32 %v1351_v42, 0.0 }
 0x30c   :  { %v1356_v62 = vpop.f32.mrb[31].mxu1 }
 0x30d   :  { %v1357_v32 = vadd.f32 %v1356_v62, %v2569_v9 }
 0x30f   :  { %v1671_v26 = vpop.f32.mrb[32].mxu1 }
 0x310   :  { %v1672_v18 = vadd.f32 %v1671_v26, %v2561_v49  ;;  %v1673_v27 = vpop.f32.mrb[33].mxu1 }
 0x311   :  { %v1674_v2 = vadd.f32 %v1673_v27, %v2561_v49 }
 0x312   :  { %v1694_v4 = vmax.f32 %v1672_v18, 0.0  ;;  %v929_v18 = vrot.slane %v928_v3, 2 }
 0x313   :  { %v1695_v30 = vmax.f32 %v1674_v2, 0.0  ;;  %v1677_v31 = vpop.f32.mrb[34].mxu1 }
 0x314   :  { %v1702_v35 = vadd.f32 %v1694_v4, %v1359_v1  ;;  %v1678_v37 = vadd.f32 %v1677_v31, %v2563_v57  ;;  %v1679_v34 = vpop.f32.mrb[35].mxu1  ;;  %v930_v4 = vadd.f32 %v929_v18, %v928_v3 }
 0x315   :  { %v1703_v50 = vadd.f32 %v1695_v30, %v1360_v61  ;;  %v1680_v49 = vadd.f32 %v1679_v34, %v2563_v57  ;;  %v1355_v57 = vadd.f32 %v1354_v52, %v2569_v9 }
 0x316   :  { %v1696_v11 = vmax.f32 %v1678_v37, 0.0  ;;  %v1710_v28 = vmul.f32 %v1702_v35, %v2573_v38  ;;  %v931_v31 = vrot.slane %v930_v4, 1 }
 0x317   :  { %v1697_v41 = vmax.f32 %v1680_v49, 0.0  ;;  %v1683_v53 = vpop.f32.mrb[36].mxu1  ;;  %v1711_v21 = vmul.f32 %v1703_v50, %v2573_v38  ;;  %v1365_v20 = vmax.f32 %v1355_v57, 0.0  ;;  %v937_v38 = vadd.f32 %v936_v22, %v2599_v44 }
 0x318   :  { %v1704_v7 = vadd.f32 %v1696_v11, %v1361_v39  ;;  %v1684_v12 = vadd.f32 %v1683_v53, %v2567_v14  ;;  %v1685_v23 = vpop.f32.mrb[37].mxu1  ;;  %v932_v42 = vadd.f32 %v931_v31, %v930_v4 }
 0x319   :  { %v1705_v25 = vadd.f32 %v1697_v41, %v1362_v36  ;;  %v1686_v58 = vadd.f32 %v1685_v23, %v2567_v14 }
 0x31a   :  { %v1712_v47 = vmul.f32 %v1704_v7, %v2575_v40  ;;  %v1698_v54 = vmax.f32 %v1684_v12, 0.0 }
 0x31b   :  { %v1713_v10 = vmul.f32 %v1705_v25, %v2575_v40  ;;  %v1699_v29 = vmax.f32 %v1686_v58, 0.0  ;;  %v1689_v15 = vpop.f32.mrb[38].mxu1  ;;  %v1366_v40 = vmax.f32 %v1357_v32, 0.0 }
 0x31c   :  { %v1718_v45 = vadd.f32 %v1712_v47, %v1710_v28  ;;  %v1706_v56 = vadd.f32 %v1698_v54, %v1363_v6  ;;  %v1690_v60 = vadd.f32 %v1689_v15, %v2571_v17  ;;  %v1691_v14 = vpop.f32.mrb[39].mxu1 }
 0x31d   :  { %v1727_v13 = vadd.f32 %v1713_v10, %v1711_v21  ;;  %v1707_v16 = vadd.f32 %v1699_v29, %v1364_v59  ;;  %v1692_v43 = vadd.f32 %v1691_v14, %v2571_v17  ;;  %v938_v17 = vrot.slane %v937_v38, 2 }
 0x31e   :  { %v1714_v9 = vmul.f32 %v1706_v56, %v2581_v19  ;;  %v1700_v0 = vmax.f32 %v1690_v60, 0.0 }
 0x31f   :  { %v1715_v24 = vmul.f32 %v1707_v16, %v2581_v19  ;;  %v1701_v52 = vmax.f32 %v1692_v43, 0.0  ;;  %v939_v44 = vadd.f32 %v938_v17, %v937_v38 }
 0x320   :  { %v1719_v62 = vadd.f32 %v1718_v45, %v1714_v9  ;;  %v1708_v55 = vadd.f32 %v1700_v0, %v1365_v20 }
 0x321   :  { %v1728_v33 = vadd.f32 %v1727_v13, %v1715_v24  ;;  %v1709_v26 = vadd.f32 %v1701_v52, %v1366_v40  ;;  %v940_v37 = vrot.slane %v939_v44, 1 }
 0x322   :  { %v1716_v27 = vmul.f32 %v1708_v55, %v2589_v5 }
 0x323   :  { %v1717_v8 = vmul.f32 %v1709_v26, %v2589_v5  ;;  %v941_v49 = vadd.f32 %v940_v37, %v939_v44  ;;  %v942_v5 = vstv %s2685_s8 }
 0x324   :  { %v1720_v2 = vadd.f32 %v1719_v62, %v1716_v27  ;;  %v943_v41 = vadd.f32 %v942_v5, %v932_v42 }
 0x325   :  { %v1729_v1 = vadd.f32 %v1728_v33, %v1717_v8  ;;  %v944_v46 = vadd.f32 %v942_v5, %v941_v49 }
 0x326   :  { %v1721_v48 = vrot.slane %v1720_v2, 4 }
 0x327   :  { %v1730_v61 = vrot.slane %v1729_v1, 4 }
 0x328   :  { %v1722_v63 = vadd.f32 %v1721_v48, %v1720_v2 }
 0x329   :  { %v1731_v30 = vadd.f32 %v1730_v61, %v1729_v1 }
 0x32a   :  { %v1723_v19 = vrot.slane %v1722_v63, 2 }
 0x32b   :  { %v1732_v35 = vrot.slane %v1731_v30, 2 }
 0x32c   :  { %v1724_v34 = vadd.f32 %v1723_v19, %v1722_v63 }
 0x32d   :  { %v1733_v51 = vadd.f32 %v1732_v35, %v1731_v30 }
 0x32e   :  { %v1725_v50 = vrot.slane %v1724_v34, 1 }
 0x32f   :  { %v1734_v39 = vrot.slane %v1733_v51, 1 }
 0x330   :  { %v1726_v11 = vadd.f32 %v1725_v50, %v1724_v34 }
 0x331   :  { %v1735_v36 = vadd.f32 %v1734_v39, %v1733_v51 }
 0x332   :  { %v1736_v53 = vadd.f32 %v1726_v11, %v942_v5 }
 0x333   :  { %v1737_v22 = vadd.f32 %v1735_v36, %v942_v5 }
 0x334   :  { %v1738_v7 = vsel %vm291_vm2, %v943_v41, %v1736_v53 }
 0x335   :  { %v1739_v12 = vsel %vm291_vm2, %v944_v46, %v1737_v22 }
 0x336   :  { %v1742_v23 = vcombine.low %v1738_v7, %v1739_v12 }
 0x338   :  { %1902 = vst.sshfl [vmem:[#allocation6] sm:$0x33 pattern:$0x76325410] %v1742_v23 }
 0x339   :  { %1974 = shalt.err (!%p1971_p9)
}
 0x33a   :  { %s1975_s16 = scalar_lea.hbm %s2686_s9, 64 }
 0x33b   :  { %p1976_p10 = scmp.ne.s32.totalorder %s2686_s9, %s1975_s16  ;;  %p1979_p11 = scmp.lt.u32.totalorder %s1975_s16, %s2686_s9 }
 0x33d   :  { %p1981_p12 = pnand %p1979_p11, %p1976_p10 }
 0x33f   :  { %1984 = shalt.err (!%p1981_p12)
}
 0x340   :  { %1761 = dma.vmem_to_hbm [thread:$0]  %s1759_s14, 64, %s2686_s9, [#allocation4]  }
 0x341   :  { %1987 = dma.done.wait [#allocation4], 64  }
 0x342   :  { %1988 = vsyncadd [#allocation4], 4294967232 }
 0x343   :  { %1765 = vsyncpa [#allocation4], 1 }
 0x344   :  { %1766 = vsyncpa [#allocation5], 1 }

</bundles_post_ra>
